<compile_context>
chip_gen: v5e
topology: v5e:2x2
jax: 0.10.0
libtpu: 0.0.40
codegen_flags: <defaults>
</compile_context>

<pallas_src>
import jax
import jax.numpy as jnp
from jax import lax
from jax.experimental import pallas as pl
from jax.experimental.pallas import tpu as pltpu

LANE = 128         # lane width: every logical feature dim is padded to this
SUBLANE = 8        # f32 sublane tile
HID = 50           # LSTM hidden size (logical)
H1 = 20            # fc1 output size (logical)


def _round_up(n, m):
    return ((n + m - 1) // m) * m


# ---------------------------------------------------------------------------
# Pallas kernel factory: one grid step = TCHUNK timesteps
# ---------------------------------------------------------------------------
def _make_actor_kernel(tchunk, t_real):
    # Only pay for the padded-step mask when T is not a multiple of TCHUNK.
    needs_mask = (t_real % tchunk) != 0

    def actor_kernel(
        x_ref,                      # (TCHUNK, B_PAD, S_PAD)   chunk of inputs
        hx0_ref, cx0_ref,           # (B_PAD, 128)             initial state
        w1_ref, b1_ref,             # (S_PAD, 128), (1, 128)
        w2_ref, b2_ref,             # (128, 128),   (1, 128)
        wgx_ref, bg_ref,            # (128, 512), (1, 512)     gates [i|f|o|g]
        wgh_ref,                    # (128, 512)
        w3_ref, b3_ref,             # (128, A_PAD), (1, A_PAD)
        y_ref,                      # (TCHUNK, B_PAD, A_PAD)   chunk of outputs
        hx_ref, cx_ref,             # (B_PAD, 128)             resident state
        gx_scr,                     # (TCHUNK, B_PAD, 512)     VMEM scratch
        h_scr,                      # (TCHUNK, B_PAD, 128)     VMEM scratch
    ):
        chunk = pl.program_id(0)

        # Initialize the resident recurrent state on the first chunk.
        @pl.when(chunk == 0)
        def _():
            hx_ref[...] = hx0_ref[...]
            cx_ref[...] = cx0_ref[...]

        tc, b, s = x_ref.shape

        # ---- Hoisted non-recurrent path: big-M matmuls over the whole chunk.
        x2 = x_ref[...].reshape(tc * b, s)
        h1 = jnp.dot(x2, w1_ref[...], preferred_element_type=jnp.float32) + b1_ref[...]
        h1 = jnp.maximum(h1, 0.0)
        h2 = jnp.dot(h1, w2_ref[...], preferred_element_type=jnp.float32) + b2_ref[...]
        h2 = jnp.maximum(h2, 0.0)
        gx = jnp.dot(h2, wgx_ref[...], preferred_element_type=jnp.float32) + bg_ref[...]
        gx_scr[...] = gx.reshape(tc, b, 4 * LANE)

        wgh = wgh_ref[...]

        # ---- Sequential recurrence: only the hidden-side projection + gate
        #      elementwise math is on the critical path.
        def step(t, carry):
            hx, cx = carry
            gates = gx_scr[t] + jnp.dot(hx, wgh, preferred_element_type=jnp.float32)
            # sigmoid(x) = 0.5*tanh(0.5*x) + 0.5  -> one EUP push for [i|f|o]
            sig = 0.5 * jnp.tanh(0.5 * gates[:, : 3 * LANE]) + 0.5
            i_g = sig[:, 0 * LANE : 1 * LANE]
            f_g = sig[:, 1 * LANE : 2 * LANE]
            o_g = sig[:, 2 * LANE : 3 * LANE]
            g_g = jnp.tanh(gates[:, 3 * LANE : 4 * LANE])
            c_new = f_g * cx + i_g * g_g
            h_new = o_g * jnp.tanh(c_new)
            if needs_mask:
                valid = chunk * tchunk + t < t_real
                h_new = jnp.where(valid, h_new, hx)
                c_new = jnp.where(valid, c_new, cx)
            h_scr[t] = h_new
            return (h_new, c_new)

        hx, cx = lax.fori_loop(0, tchunk, step, (hx_ref[...], cx_ref[...]))
        hx_ref[...] = hx
        cx_ref[...] = cx

        # ---- Batched fc3 + tanh over the whole chunk (off the critical path).
        h_all = h_scr[...].reshape(tc * b, LANE)
        y = jnp.dot(h_all, w3_ref[...], preferred_element_type=jnp.float32) + b3_ref[...]
        y_ref[...] = jnp.tanh(y).reshape(tc, b, y.shape[-1])

    return actor_kernel


# ---------------------------------------------------------------------------
# Host-side parameter packing (pad to lanes, fuse gate weights)
# ---------------------------------------------------------------------------
def pack_actor_params(p, nb_states, nb_actions):
    S_PAD = _round_up(max(nb_states, 1), LANE)
    A_PAD = _round_up(max(nb_actions, 1), LANE)
    H1_PAD = LANE
    H2_PAD = LANE
    HID_PAD = LANE

    def pad2(a, rows, cols):
        out = jnp.zeros((rows, cols), jnp.float32)
        return out.at[: a.shape[0], : a.shape[1]].set(a.astype(jnp.float32))

    packed = {
        "w1": pad2(p["w1"], S_PAD, H1_PAD),
        "b1": pad2(p["b1"], 1, H1_PAD),
        "w2": pad2(p["w2"], H1_PAD, H2_PAD),
        "b2": pad2(p["b2"], 1, H2_PAD),
        "w3": pad2(p["w3"], HID_PAD, A_PAD),
        "b3": pad2(p["b3"], 1, A_PAD),
    }

    # Kernel gate order is [i, f, o, g] (sigmoid gates contiguous, tanh gate
    # last).  NOTE: this differs from PyTorch's internal [i, f, g, o] packing;
    # importing torch.nn.LSTMCell weights requires re-slicing into this order.
    wgx = jnp.zeros((H2_PAD, 4 * HID_PAD), jnp.float32)
    wgh = jnp.zeros((HID_PAD, 4 * HID_PAD), jnp.float32)
    bg = jnp.zeros((1, 4 * HID_PAD), jnp.float32)
    for k, g in enumerate(("i", "f", "o", "g")):
        c0 = k * HID_PAD
        wgx = wgx.at[:HID, c0 : c0 + HID].set(p[f"wx{g}"].astype(jnp.float32))
        wgh = wgh.at[:HID, c0 : c0 + HID].set(p[f"wh{g}"].astype(jnp.float32))
        bg = bg.at[:, c0 : c0 + HID].set(p[f"b{g}"].astype(jnp.float32))
    packed.update(wgx=wgx, wgh=wgh, bg=bg)

    dims = dict(S_PAD=S_PAD, A_PAD=A_PAD, HID_PAD=HID_PAD,
                nb_states=nb_states, nb_actions=nb_actions)
    return packed, dims


# ---------------------------------------------------------------------------
# Wrappers
# ---------------------------------------------------------------------------
def actor_rollout(x_seq, packed, dims, hidden_states, tchunk=32):
    """x_seq: (T, B, nb_states) f32; hidden_states: (hx, cx) each (B, 50) f32.

    Returns (y_seq (T, B, nb_actions), (hx_T, cx_T)).  Weights stay VMEM
    resident across the whole rollout; hx/cx never round-trip through HBM.
    """
    hx, cx = hidden_states
    T, B, nb_states = x_seq.shape
    S_PAD, A_PAD, HID_PAD = dims["S_PAD"], dims["A_PAD"], dims["HID_PAD"]
    nb_actions = dims["nb_actions"]
    B_PAD = max(SUBLANE, _round_up(B, SUBLANE))

    tchunk = max(1, min(int(tchunk), T))
    n_chunks = -(-T // tchunk)
    T_PAD = n_chunks * tchunk

    xp = jnp.zeros((T_PAD, B_PAD, S_PAD), jnp.float32).at[:T, :B, :nb_states].set(x_seq)
    hxp = jnp.zeros((B_PAD, HID_PAD), jnp.float32).at[:B, :HID].set(hx)
    cxp = jnp.zeros((B_PAD, HID_PAD), jnp.float32).at[:B, :HID].set(cx)

    def resident(shape):
        # Whole-array block whose index never changes -> loaded/held in VMEM once.
        n = len(shape)
        return pl.BlockSpec(shape, lambda c, _n=n: (0,) * _n)

    in_specs = [
        pl.BlockSpec((tchunk, B_PAD, S_PAD), lambda c: (c, 0, 0)),   # x, per chunk
        resident((B_PAD, HID_PAD)),                                  # hx0
        resident((B_PAD, HID_PAD)),                                  # cx0
        resident(tuple(packed["w1"].shape)),
        resident(tuple(packed["b1"].shape)),
        resident(tuple(packed["w2"].shape)),
        resident(tuple(packed["b2"].shape)),
        resident(tuple(packed["wgx"].shape)),
        resident(tuple(packed["bg"].shape)),
        resident(tuple(packed["wgh"].shape)),
        resident(tuple(packed["w3"].shape)),
        resident(tuple(packed["b3"].shape)),
    ]
    out_specs = (
        pl.BlockSpec((tchunk, B_PAD, A_PAD), lambda c: (c, 0, 0)),   # y per chunk
        resident((B_PAD, HID_PAD)),                                  # final hx
        resident((B_PAD, HID_PAD)),                                  # final cx
    )
    out_shapes = (
        jax.ShapeDtypeStruct((T_PAD, B_PAD, A_PAD), jnp.float32),
        jax.ShapeDtypeStruct((B_PAD, HID_PAD), jnp.float32),
        jax.ShapeDtypeStruct((B_PAD, HID_PAD), jnp.float32),
    )
    scratch_shapes = [
        pltpu.VMEM((tchunk, B_PAD, 4 * LANE), jnp.float32),   # gates_x per chunk
        pltpu.VMEM((tchunk, B_PAD, LANE), jnp.float32),       # h_new per chunk
    ]

    kernel = _make_actor_kernel(tchunk, T)

    y_pad, hx_pad, cx_pad = pl.pallas_call(
        kernel,
        grid=(n_chunks,),
        in_specs=in_specs,
        out_specs=out_specs,
        out_shape=out_shapes,
        scratch_shapes=scratch_shapes,
        compiler_params=pltpu.CompilerParams(
            dimension_semantics=("arbitrary",),   # time axis is sequential
        ),
    )(
        xp, hxp, cxp,
        packed["w1"], packed["b1"],
        packed["w2"], packed["b2"],
        packed["wgx"], packed["bg"], packed["wgh"],
        packed["w3"], packed["b3"],
    )

    y = y_pad[:T, :B, :nb_actions]
    return y, (hx_pad[:B, :HID], cx_pad[:B, :HID])


def actor_forward(x, packed, dims, hidden_states):
    """Single-step forward, identical to the PyTorch module's forward()."""
    y, (hx, cx) = actor_rollout(x[None], packed, dims, hidden_states, tchunk=1)
    return y[0], (hx, cx)


# ---------------------------------------------------------------------------
# Deterministic parameter init (mirrors the PyTorch module's shapes/init)
# ---------------------------------------------------------------------------
def init_actor_params(key, nb_states, nb_actions, init_w=0.003):
    def unif(k, shape, bound):
        return jax.random.uniform(k, shape, jnp.float32, -bound, bound)

    keys = jax.random.split(key, 24)
    ki = iter(keys)

    # fc1: fanin_init uses weight.size()[0] == 20; bias default U(-1/sqrt(in), ...)
    w1 = unif(next(ki), (nb_states, H1), 1.0 / (H1 ** 0.5))          # stored (in, out)
    b1 = unif(next(ki), (1, H1), 1.0 / (float(nb_states) ** 0.5))
    # fc2: fanin_init uses 50
    w2 = unif(next(ki), (H1, HID), 1.0 / (HID ** 0.5))
    b2 = unif(next(ki), (1, HID), 1.0 / (H1 ** 0.5))
    # fc3: weight ~ U(-init_w, init_w); bias default U(-1/sqrt(50), ...)
    w3 = unif(next(ki), (HID, nb_actions), init_w)
    b3 = unif(next(ki), (1, nb_actions), 1.0 / (HID ** 0.5))

    p = dict(w1=w1, b1=b1, w2=w2, b2=b2, w3=w3, b3=b3)

    # LSTMCell(50, 50): every parameter ~ U(-1/sqrt(50), 1/sqrt(50)); combined
    # bias is the SUM of two independent uniform draws (b_ih + b_hh).
    k_b = 1.0 / (HID ** 0.5)
    for g in ("i", "f", "g", "o"):
        p[f"wx{g}"] = unif(next(ki), (HID, HID), k_b)   # input->hidden (in, out)
        p[f"wh{g}"] = unif(next(ki), (HID, HID), k_b)   # hidden->hidden (in, out)
        b_ih = unif(next(ki), (1, HID), k_b)
        b_hh = unif(next(ki), (1, HID), k_b)
        p[f"b{g}"] = b_ih + b_hh
    return p


# ---------------------------------------------------------------------------
# Pure-JAX reference (unpacked params) for correctness checking
# ---------------------------------------------------------------------------
def actor_step_ref(p, x, hx, cx):
    h1 = jax.nn.relu(x @ p["w1"] + p["b1"])
    h2 = jax.nn.relu(h1 @ p["w2"] + p["b2"])
    i = jax.nn.sigmoid(h2 @ p["wxi"] + hx @ p["whi"] + p["bi"])
    f = jax.nn.sigmoid(h2 @ p["wxf"] + hx @ p["whf"] + p["bf"])
    g = jnp.tanh(h2 @ p["wxg"] + hx @ p["whg"] + p["bg"])
    o = jax.nn.sigmoid(h2 @ p["wxo"] + hx @ p["who"] + p["bo"])
    c_new = f * cx + i * g
    h_new = o * jnp.tanh(c_new)
    y = jnp.tanh(h_new @ p["w3"] + p["b3"])
    return y, h_new, c_new


if __name__ == "__main__":
    nb_states, nb_actions, batch = 8, 4, 2
    T, tchunk = 11, 4   # T not a multiple of tchunk -> exercises the ragged mask

    key = jax.random.PRNGKey(0)
    k_param, k_x = jax.random.split(key)
    params = init_actor_params(k_param, nb_states, nb_actions)
    packed, dims = pack_actor_params(params, nb_states, nb_actions)

    x_seq = jax.random.normal(k_x, (T, batch, nb_states), jnp.float32)
    hx0 = jnp.zeros((batch, HID), jnp.float32)   # reset_lstm_hidden_state(done=True)
    cx0 = jnp.zeros((batch, HID), jnp.float32)

    # --- multi-step rollout through the single pallas_call (weights resident) ---
    y_seq, (hxT, cxT) = actor_rollout(x_seq, packed, dims, (hx0, cx0), tchunk=tchunk)
    jax.block_until_ready((y_seq, hxT, cxT))

    # reference rollout
    hx_r, cx_r = hx0, cx0
    y_refs = []
    for t in range(T):
        y_r, hx_r, cx_r = actor_step_ref(params, x_seq[t], hx_r, cx_r)
        y_refs.append(y_r)
    y_ref_seq = jnp.stack(y_refs)

    assert jnp.allclose(y_seq, y_ref_seq, atol=2e-5), "rollout action mismatch"
    assert jnp.allclose(hxT, hx_r, atol=2e-5), "rollout hx mismatch"
    assert jnp.allclose(cxT, cx_r, atol=2e-5), "rollout cx mismatch"

    # --- single-step forward (module's forward() semantics) ---
    y1, (hx1, cx1) = actor_forward(x_seq[0], packed, dims, (hx0, cx0))
    jax.block_until_ready((y1, hx1, cx1))
    y1_ref, hx1_ref, cx1_ref = actor_step_ref(params, x_seq[0], hx0, cx0)
    assert jnp.allclose(y1, y1_ref, atol=2e-5), "single-step action mismatch"
    assert jnp.allclose(hx1, hx1_ref, atol=2e-5), "single-step hx mismatch"
    assert jnp.allclose(cx1, cx1_ref, atol=2e-5), "single-step cx mismatch"

    print("KERNEL_OK")
</pallas_src>

<mosaic_0001>
module attributes {stable_mosaic.version = 11 : i64} {
  func.func @actor_kernel(%arg0: i32, %arg1: memref<4x8x128xf32, #tpu.memory_space<vmem>>, %arg2: memref<8x128xf32, #tpu.memory_space<vmem>>, %arg3: memref<8x128xf32, #tpu.memory_space<vmem>>, %arg4: memref<128x128xf32, #tpu.memory_space<vmem>>, %arg5: memref<1x128xf32, #tpu.memory_space<vmem>>, %arg6: memref<128x128xf32, #tpu.memory_space<vmem>>, %arg7: memref<1x128xf32, #tpu.memory_space<vmem>>, %arg8: memref<128x512xf32, #tpu.memory_space<vmem>>, %arg9: memref<1x512xf32, #tpu.memory_space<vmem>>, %arg10: memref<128x512xf32, #tpu.memory_space<vmem>>, %arg11: memref<128x128xf32, #tpu.memory_space<vmem>>, %arg12: memref<1x128xf32, #tpu.memory_space<vmem>>, %arg13: memref<4x8x128xf32, #tpu.memory_space<vmem>>, %arg14: memref<8x128xf32, #tpu.memory_space<vmem>>, %arg15: memref<8x128xf32, #tpu.memory_space<vmem>>, %arg16: memref<4x8x512xf32, #tpu.memory_space<vmem>>, %arg17: memref<4x8x128xf32, #tpu.memory_space<vmem>>) attributes {dimension_semantics = [#tpu.dimension_semantics<arbitrary>], iteration_bounds = array<i64: 3>, scalar_prefetch = 0 : i64, scratch_operands = 2 : i64, tpu.core_type = #tpu.core_type<tc>, window_params = [{transform_indices = @transform_0, window_bounds = array<i64: 4, 8, 128>}, {pipeline_mode = #tpu.pipeline_mode<synchronous>, transform_indices = @transform_1, window_bounds = array<i64: 8, 128>}, {pipeline_mode = #tpu.pipeline_mode<synchronous>, transform_indices = @transform_2, window_bounds = array<i64: 8, 128>}, {pipeline_mode = #tpu.pipeline_mode<synchronous>, transform_indices = @transform_3, window_bounds = array<i64: 128, 128>}, {pipeline_mode = #tpu.pipeline_mode<synchronous>, transform_indices = @transform_4, window_bounds = array<i64: 1, 128>}, {pipeline_mode = #tpu.pipeline_mode<synchronous>, transform_indices = @transform_5, window_bounds = array<i64: 128, 128>}, {pipeline_mode = #tpu.pipeline_mode<synchronous>, transform_indices = @transform_6, window_bounds = array<i64: 1, 128>}, {pipeline_mode = #tpu.pipeline_mode<synchronous>, transform_indices = @transform_7, window_bounds = array<i64: 128, 512>}, {pipeline_mode = #tpu.pipeline_mode<synchronous>, transform_indices = @transform_8, window_bounds = array<i64: 1, 512>}, {pipeline_mode = #tpu.pipeline_mode<synchronous>, transform_indices = @transform_9, window_bounds = array<i64: 128, 512>}, {pipeline_mode = #tpu.pipeline_mode<synchronous>, transform_indices = @transform_10, window_bounds = array<i64: 128, 128>}, {pipeline_mode = #tpu.pipeline_mode<synchronous>, transform_indices = @transform_11, window_bounds = array<i64: 1, 128>}, {transform_indices = @transform_12, window_bounds = array<i64: 4, 8, 128>}, {pipeline_mode = #tpu.pipeline_mode<synchronous>, transform_indices = @transform_13, window_bounds = array<i64: 8, 128>}, {pipeline_mode = #tpu.pipeline_mode<synchronous>, transform_indices = @transform_14, window_bounds = array<i64: 8, 128>}]} {
    %c0_i32 = arith.constant 0 : i32
    %0 = arith.cmpi eq, %arg0, %c0_i32 : i32
    %1 = arith.extui %0 : i1 to i32
    %c0_i32_0 = arith.constant 0 : i32
    %2 = arith.cmpi ne, %1, %c0_i32_0 : i32
    scf.if %2 {
      %c0_45 = arith.constant 0 : index
      %c0_46 = arith.constant 0 : index
      %43 = vector.load %arg2[%c0_45, %c0_46] : memref<8x128xf32, #tpu.memory_space<vmem>>, vector<8x128xf32>
      %c0_47 = arith.constant 0 : index
      %c0_48 = arith.constant 0 : index
      %44 = vector.load %arg14[%c0_47, %c0_48] : memref<8x128xf32, #tpu.memory_space<vmem>>, vector<8x128xf32>
      tpu.vector_store %arg14[%c0_47, %c0_48], %43 {strides = array<i32>} : memref<8x128xf32, #tpu.memory_space<vmem>>, vector<8x128xf32>,
      %c0_49 = arith.constant 0 : index
      %c0_50 = arith.constant 0 : index
      %45 = vector.load %arg3[%c0_49, %c0_50] : memref<8x128xf32, #tpu.memory_space<vmem>>, vector<8x128xf32>
      %c0_51 = arith.constant 0 : index
      %c0_52 = arith.constant 0 : index
      %46 = vector.load %arg15[%c0_51, %c0_52] : memref<8x128xf32, #tpu.memory_space<vmem>>, vector<8x128xf32>
      tpu.vector_store %arg15[%c0_51, %c0_52], %45 {strides = array<i32>} : memref<8x128xf32, #tpu.memory_space<vmem>>, vector<8x128xf32>,
    } else {
    }
    %c0 = arith.constant 0 : index
    %c0_1 = arith.constant 0 : index
    %c0_2 = arith.constant 0 : index
    %3 = vector.load %arg1[%c0, %c0_1, %c0_2] : memref<4x8x128xf32, #tpu.memory_space<vmem>>, vector<4x8x128xf32>
    %4 = vector.shape_cast %3 : vector<4x8x128xf32> to vector<32x128xf32>
    %c0_3 = arith.constant 0 : index
    %c0_4 = arith.constant 0 : index
    %5 = vector.load %arg4[%c0_3, %c0_4] : memref<128x128xf32, #tpu.memory_space<vmem>>, vector<128x128xf32>
    %cst = arith.constant dense<0.000000e+00> : vector<32x128xf32>
    %6 = tpu.matmul %4, %5, %cst {dimension_numbers = #tpu.dot_dimension_numbers<[1], [0], [0], [1], [0, 0, 1, 1], [], []>} : vector<32x128xf32>, vector<128x128xf32>, vector<32x128xf32> -> vector<32x128xf32>
    %c0_5 = arith.constant 0 : index
    %c0_6 = arith.constant 0 : index
    %7 = vector.load %arg5[%c0_5, %c0_6] : memref<1x128xf32, #tpu.memory_space<vmem>>, vector<1x128xf32>
    %8 = vector.broadcast %7 : vector<1x128xf32> to vector<32x128xf32>
    %9 = arith.addf %6, %8 : vector<32x128xf32>
    %cst_7 = arith.constant 0.000000e+00 : f32
    %10 = vector.broadcast %cst_7 : f32 to vector<32x128xf32>
    %11 = arith.maximumf %9, %10 : vector<32x128xf32>
    %c0_8 = arith.constant 0 : index
    %c0_9 = arith.constant 0 : index
    %12 = vector.load %arg6[%c0_8, %c0_9] : memref<128x128xf32, #tpu.memory_space<vmem>>, vector<128x128xf32>
    %cst_10 = arith.constant dense<0.000000e+00> : vector<32x128xf32>
    %13 = tpu.matmul %11, %12, %cst_10 {dimension_numbers = #tpu.dot_dimension_numbers<[1], [0], [0], [1], [0, 0, 1, 1], [], []>} : vector<32x128xf32>, vector<128x128xf32>, vector<32x128xf32> -> vector<32x128xf32>
    %c0_11 = arith.constant 0 : index
    %c0_12 = arith.constant 0 : index
    %14 = vector.load %arg7[%c0_11, %c0_12] : memref<1x128xf32, #tpu.memory_space<vmem>>, vector<1x128xf32>
    %15 = vector.broadcast %14 : vector<1x128xf32> to vector<32x128xf32>
    %16 = arith.addf %13, %15 : vector<32x128xf32>
    %cst_13 = arith.constant 0.000000e+00 : f32
    %17 = vector.broadcast %cst_13 : f32 to vector<32x128xf32>
    %18 = arith.maximumf %16, %17 : vector<32x128xf32>
    %c0_14 = arith.constant 0 : index
    %c0_15 = arith.constant 0 : index
    %19 = vector.load %arg8[%c0_14, %c0_15] : memref<128x512xf32, #tpu.memory_space<vmem>>, vector<128x512xf32>
    %cst_16 = arith.constant dense<0.000000e+00> : vector<32x512xf32>
    %20 = tpu.matmul %18, %19, %cst_16 {dimension_numbers = #tpu.dot_dimension_numbers<[1], [0], [0], [1], [0, 0, 1, 1], [], []>} : vector<32x128xf32>, vector<128x512xf32>, vector<32x512xf32> -> vector<32x512xf32>
    %c0_17 = arith.constant 0 : index
    %c0_18 = arith.constant 0 : index
    %21 = vector.load %arg9[%c0_17, %c0_18] : memref<1x512xf32, #tpu.memory_space<vmem>>, vector<1x512xf32>
    %22 = vector.broadcast %21 : vector<1x512xf32> to vector<32x512xf32>
    %23 = arith.addf %20, %22 : vector<32x512xf32>
    %24 = vector.shape_cast %23 : vector<32x512xf32> to vector<4x8x512xf32>
    %c0_19 = arith.constant 0 : index
    %c0_20 = arith.constant 0 : index
    %c0_21 = arith.constant 0 : index
    %25 = vector.load %arg16[%c0_19, %c0_20, %c0_21] : memref<4x8x512xf32, #tpu.memory_space<vmem>>, vector<4x8x512xf32>
    tpu.vector_store %arg16[%c0_19, %c0_20, %c0_21], %24 {strides = array<i32>} : memref<4x8x512xf32, #tpu.memory_space<vmem>>, vector<4x8x512xf32>,
    %c0_22 = arith.constant 0 : index
    %c0_23 = arith.constant 0 : index
    %26 = vector.load %arg10[%c0_22, %c0_23] : memref<128x512xf32, #tpu.memory_space<vmem>>, vector<128x512xf32>
    %c0_24 = arith.constant 0 : index
    %c0_25 = arith.constant 0 : index
    %27 = vector.load %arg14[%c0_24, %c0_25] : memref<8x128xf32, #tpu.memory_space<vmem>>, vector<8x128xf32>
    %c0_26 = arith.constant 0 : index
    %c0_27 = arith.constant 0 : index
    %28 = vector.load %arg15[%c0_26, %c0_27] : memref<8x128xf32, #tpu.memory_space<vmem>>, vector<8x128xf32>
    %c0_i32_28 = arith.constant 0 : i32
    %c4_i32 = arith.constant 4 : i32
    %29 = arith.addi %c0_i32_28, %c4_i32 : i32
    %c1_i32 = arith.constant 1 : i32
    %30:2 = scf.for %arg18 = %c0_i32_28 to %29 step %c1_i32 iter_args(%arg19 = %27, %arg20 = %28) -> (vector<8x128xf32>, vector<8x128xf32>)  : i32 {
      %43 = arith.index_cast %arg18 : i32 to index
      %c0_45 = arith.constant 0 : index
      %c0_46 = arith.constant 0 : index
      %44 = vector.load %arg16[%43, %c0_45, %c0_46] : memref<4x8x512xf32, #tpu.memory_space<vmem>>, vector<1x8x512xf32>
      %45 = vector.shape_cast %44 : vector<1x8x512xf32> to vector<8x512xf32>
      %cst_47 = arith.constant dense<0.000000e+00> : vector<8x512xf32>
      %46 = tpu.matmul %arg19, %26, %cst_47 {dimension_numbers = #tpu.dot_dimension_numbers<[1], [0], [0], [1], [0, 0, 1, 1], [], []>} : vector<8x128xf32>, vector<128x512xf32>, vector<8x512xf32> -> vector<8x512xf32>
      %47 = arith.addf %45, %46 : vector<8x512xf32>
      %48 = vector.extract_strided_slice %47 {offsets = [0, 0], sizes = [8, 384], strides = [1, 1]} : vector<8x512xf32> to vector<8x384xf32>
      %cst_48 = arith.constant 5.000000e-01 : f32
      %49 = vector.broadcast %cst_48 : f32 to vector<8x384xf32>
      %50 = arith.mulf %49, %48 : vector<8x384xf32>
      %51 = math.tanh %50 : vector<8x384xf32>
      %cst_49 = arith.constant 5.000000e-01 : f32
      %52 = vector.broadcast %cst_49 : f32 to vector<8x384xf32>
      %53 = arith.mulf %52, %51 : vector<8x384xf32>
      %cst_50 = arith.constant 5.000000e-01 : f32
      %54 = vector.broadcast %cst_50 : f32 to vector<8x384xf32>
      %55 = arith.addf %53, %54 : vector<8x384xf32>
      %56 = vector.extract_strided_slice %55 {offsets = [0, 0], sizes = [8, 128], strides = [1, 1]} : vector<8x384xf32> to vector<8x128xf32>
      %57 = vector.extract_strided_slice %55 {offsets = [0, 128], sizes = [8, 128], strides = [1, 1]} : vector<8x384xf32> to vector<8x128xf32>
      %58 = vector.extract_strided_slice %55 {offsets = [0, 256], sizes = [8, 128], strides = [1, 1]} : vector<8x384xf32> to vector<8x128xf32>
      %59 = vector.extract_strided_slice %47 {offsets = [0, 384], sizes = [8, 128], strides = [1, 1]} : vector<8x512xf32> to vector<8x128xf32>
      %60 = math.tanh %59 : vector<8x128xf32>
      %61 = arith.mulf %57, %arg20 : vector<8x128xf32>
      %62 = arith.mulf %56, %60 : vector<8x128xf32>
      %63 = arith.addf %61, %62 : vector<8x128xf32>
      %64 = math.tanh %63 : vector<8x128xf32>
      %65 = arith.mulf %58, %64 : vector<8x128xf32>
      %c4_i32_51 = arith.constant 4 : i32
      %66 = arith.muli %arg0, %c4_i32_51 : i32
      %67 = arith.addi %66, %arg18 : i32
      %c11_i32 = arith.constant 11 : i32
      %68 = arith.cmpi slt, %67, %c11_i32 : i32
      %69 = arith.select %68, %65, %arg19 : vector<8x128xf32>
      %70 = arith.select %68, %63, %arg20 : vector<8x128xf32>
      %71 = arith.index_cast %arg18 : i32 to index
      %c0_52 = arith.constant 0 : index
      %c0_53 = arith.constant 0 : index
      %72 = vector.load %arg17[%71, %c0_52, %c0_53] : memref<4x8x128xf32, #tpu.memory_space<vmem>>, vector<1x8x128xf32>
      %73 = vector.shape_cast %72 : vector<1x8x128xf32> to vector<8x128xf32>
      %74 = vector.shape_cast %69 : vector<8x128xf32> to vector<1x8x128xf32>
      tpu.vector_store %arg17[%71, %c0_52, %c0_53], %74 {strides = array<i32>} : memref<4x8x128xf32, #tpu.memory_space<vmem>>, vector<1x8x128xf32>,
      scf.yield %69, %70 : vector<8x128xf32>, vector<8x128xf32>
    }
    %c4_i32_29 = arith.constant 4 : i32
    %c0_30 = arith.constant 0 : index
    %c0_31 = arith.constant 0 : index
    %31 = vector.load %arg14[%c0_30, %c0_31] : memref<8x128xf32, #tpu.memory_space<vmem>>, vector<8x128xf32>
    tpu.vector_store %arg14[%c0_30, %c0_31], %30#0 {strides = array<i32>} : memref<8x128xf32, #tpu.memory_space<vmem>>, vector<8x128xf32>,
    %c0_32 = arith.constant 0 : index
    %c0_33 = arith.constant 0 : index
    %32 = vector.load %arg15[%c0_32, %c0_33] : memref<8x128xf32, #tpu.memory_space<vmem>>, vector<8x128xf32>
    tpu.vector_store %arg15[%c0_32, %c0_33], %30#1 {strides = array<i32>} : memref<8x128xf32, #tpu.memory_space<vmem>>, vector<8x128xf32>,
    %c0_34 = arith.constant 0 : index
    %c0_35 = arith.constant 0 : index
    %c0_36 = arith.constant 0 : index
    %33 = vector.load %arg17[%c0_34, %c0_35, %c0_36] : memref<4x8x128xf32, #tpu.memory_space<vmem>>, vector<4x8x128xf32>
    %34 = vector.shape_cast %33 : vector<4x8x128xf32> to vector<32x128xf32>
    %c0_37 = arith.constant 0 : index
    %c0_38 = arith.constant 0 : index
    %35 = vector.load %arg11[%c0_37, %c0_38] : memref<128x128xf32, #tpu.memory_space<vmem>>, vector<128x128xf32>
    %cst_39 = arith.constant dense<0.000000e+00> : vector<32x128xf32>
    %36 = tpu.matmul %34, %35, %cst_39 {dimension_numbers = #tpu.dot_dimension_numbers<[1], [0], [0], [1], [0, 0, 1, 1], [], []>} : vector<32x128xf32>, vector<128x128xf32>, vector<32x128xf32> -> vector<32x128xf32>
    %c0_40 = arith.constant 0 : index
    %c0_41 = arith.constant 0 : index
    %37 = vector.load %arg12[%c0_40, %c0_41] : memref<1x128xf32, #tpu.memory_space<vmem>>, vector<1x128xf32>
    %38 = vector.broadcast %37 : vector<1x128xf32> to vector<32x128xf32>
    %39 = arith.addf %36, %38 : vector<32x128xf32>
    %40 = math.tanh %39 : vector<32x128xf32>
    %41 = vector.shape_cast %40 : vector<32x128xf32> to vector<4x8x128xf32>
    %c0_42 = arith.constant 0 : index
    %c0_43 = arith.constant 0 : index
    %c0_44 = arith.constant 0 : index
    %42 = vector.load %arg13[%c0_42, %c0_43, %c0_44] : memref<4x8x128xf32, #tpu.memory_space<vmem>>, vector<4x8x128xf32>
    tpu.vector_store %arg13[%c0_42, %c0_43, %c0_44], %41 {strides = array<i32>} : memref<4x8x128xf32, #tpu.memory_space<vmem>>, vector<4x8x128xf32>,
    return
  }
  func.func @transform_0(%arg0: i32) -> (i32, i32, i32) {
    %c0_i32 = arith.constant 0 : i32
    %c0_i32_0 = arith.constant 0 : i32
    %c0_i32_1 = arith.constant 0 : i32
    return %arg0, %c0_i32, %c0_i32_0 : i32, i32, i32
  }
  func.func @transform_1(%arg0: i32) -> (i32, i32) {
    %c0_i32 = arith.constant 0 : i32
    %c0_i32_0 = arith.constant 0 : i32
    %c0_i32_1 = arith.constant 0 : i32
    return %c0_i32, %c0_i32_0 : i32, i32
  }
  func.func @transform_2(%arg0: i32) -> (i32, i32) {
    %c0_i32 = arith.constant 0 : i32
    %c0_i32_0 = arith.constant 0 : i32
    %c0_i32_1 = arith.constant 0 : i32
    return %c0_i32, %c0_i32_0 : i32, i32
  }
  func.func @transform_3(%arg0: i32) -> (i32, i32) {
    %c0_i32 = arith.constant 0 : i32
    %c0_i32_0 = arith.constant 0 : i32
    %c0_i32_1 = arith.constant 0 : i32
    return %c0_i32, %c0_i32_0 : i32, i32
  }
  func.func @transform_4(%arg0: i32) -> (i32, i32) {
    %c0_i32 = arith.constant 0 : i32
    %c0_i32_0 = arith.constant 0 : i32
    %c0_i32_1 = arith.constant 0 : i32
    return %c0_i32, %c0_i32_0 : i32, i32
  }
  func.func @transform_5(%arg0: i32) -> (i32, i32) {
    %c0_i32 = arith.constant 0 : i32
    %c0_i32_0 = arith.constant 0 : i32
    %c0_i32_1 = arith.constant 0 : i32
    return %c0_i32, %c0_i32_0 : i32, i32
  }
  func.func @transform_6(%arg0: i32) -> (i32, i32) {
    %c0_i32 = arith.constant 0 : i32
    %c0_i32_0 = arith.constant 0 : i32
    %c0_i32_1 = arith.constant 0 : i32
    return %c0_i32, %c0_i32_0 : i32, i32
  }
  func.func @transform_7(%arg0: i32) -> (i32, i32) {
    %c0_i32 = arith.constant 0 : i32
    %c0_i32_0 = arith.constant 0 : i32
    %c0_i32_1 = arith.constant 0 : i32
    return %c0_i32, %c0_i32_0 : i32, i32
  }
  func.func @transform_8(%arg0: i32) -> (i32, i32) {
    %c0_i32 = arith.constant 0 : i32
    %c0_i32_0 = arith.constant 0 : i32
    %c0_i32_1 = arith.constant 0 : i32
    return %c0_i32, %c0_i32_0 : i32, i32
  }
  func.func @transform_9(%arg0: i32) -> (i32, i32) {
    %c0_i32 = arith.constant 0 : i32
    %c0_i32_0 = arith.constant 0 : i32
    %c0_i32_1 = arith.constant 0 : i32
    return %c0_i32, %c0_i32_0 : i32, i32
  }
  func.func @transform_10(%arg0: i32) -> (i32, i32) {
    %c0_i32 = arith.constant 0 : i32
    %c0_i32_0 = arith.constant 0 : i32
    %c0_i32_1 = arith.constant 0 : i32
    return %c0_i32, %c0_i32_0 : i32, i32
  }
  func.func @transform_11(%arg0: i32) -> (i32, i32) {
    %c0_i32 = arith.constant 0 : i32
    %c0_i32_0 = arith.constant 0 : i32
    %c0_i32_1 = arith.constant 0 : i32
    return %c0_i32, %c0_i32_0 : i32, i32
  }
  func.func @transform_12(%arg0: i32) -> (i32, i32, i32) {
    %c0_i32 = arith.constant 0 : i32
    %c0_i32_0 = arith.constant 0 : i32
    %c0_i32_1 = arith.constant 0 : i32
    return %arg0, %c0_i32, %c0_i32_0 : i32, i32, i32
  }
  func.func @transform_13(%arg0: i32) -> (i32, i32) {
    %c0_i32 = arith.constant 0 : i32
    %c0_i32_0 = arith.constant 0 : i32
    %c0_i32_1 = arith.constant 0 : i32
    return %c0_i32, %c0_i32_0 : i32, i32
  }
  func.func @transform_14(%arg0: i32) -> (i32, i32) {
    %c0_i32 = arith.constant 0 : i32
    %c0_i32_0 = arith.constant 0 : i32
    %c0_i32_1 = arith.constant 0 : i32
    return %c0_i32, %c0_i32_0 : i32, i32
  }
}

</mosaic_0001>

<bundles_post_ra>
// kernel: tpu_custom_call.1
= control target key start
LH: loop header
LB: loop body
LE: loop exit
PB: predicated region body
PF: predicated region fallthrough
CT: control target
= control target key end

     0   :  { %s2786_s0 = inlined_call_operand.hbm [shape: f32[12,8,128], index: 0, kind: input, shape index: {}]   ;;  %s2787_s1 = inlined_call_operand.hbm [shape: f32[8,128], index: 1, kind: input, shape index: {}]   ;;  %s2788_s2 = inlined_call_operand.hbm [shape: f32[8,128], index: 2, kind: input, shape index: {}]   ;;  %s2789_s3 = inlined_call_operand.hbm [shape: f32[128,128], index: 3, kind: input, shape index: {}]   ;;  %s2790_s4 = inlined_call_operand.vmem [shape: f32[1,128], index: 4, kind: input, shape index: {}]   ;;  %s2791_s5 = inlined_call_operand.hbm [shape: f32[128,128], index: 5, kind: input, shape index: {}]   ;;  %s2792_s6 = inlined_call_operand.vmem [shape: f32[1,128], index: 6, kind: input, shape index: {}]   ;;  %s2793_s7 = inlined_call_operand.hbm [shape: f32[128,512], index: 7, kind: input, shape index: {}]   ;;  %s2794_s8 = inlined_call_operand.vmem [shape: f32[1,512], index: 8, kind: input, shape index: {}]   ;;  %s2795_s9 = inlined_call_operand.hbm [shape: f32[128,512], index: 9, kind: input, shape index: {}]   ;;  %s2796_s10 = inlined_call_operand.hbm [shape: f32[128,128], index: 10, kind: input, shape index: {}]   ;;  %s2797_s11 = inlined_call_operand.vmem [shape: f32[1,128], index: 11, kind: input, shape index: {}]   ;;  %s2798_s12 = inlined_call_operand.hbm [shape: f32[12,8,128], index: 12, kind: output, shape index: {0}]   ;;  %s2799_s13 = inlined_call_operand.hbm [shape: f32[8,128], index: 13, kind: output, shape index: {1}]   ;;  %s2800_s14 = inlined_call_operand.hbm [shape: f32[8,128], index: 14, kind: output, shape index: {2}]  }
   0x1   :  { %2807 = sst [smem:[#allocation48_spill]] %s2787_s1 }
   0x2   :  { %2808 = sst [smem:[#allocation49_spill]] %s2788_s2 }
   0x3   :  { %2809 = sst [smem:[#allocation50_spill]] %s2789_s3 }
   0x4   :  { %2810 = sst [smem:[#allocation51_spill]] %s2791_s5 }
   0x5   :  { %2811 = sst [smem:[#allocation52_spill]] %s2793_s7 }
   0x6   :  { %2812 = sst [smem:[#allocation53_spill]] %s2795_s9 }
   0x7   :  { %2813 = sst [smem:[#allocation54_spill]] %s2796_s10 }
   0x8   :  { %2814 = sst [smem:[#allocation55_spill]] %s2797_s11 }
   0x9   :  { %2815 = sst [smem:[#allocation56_spill]] %s2798_s12 }
   0xa   :  { %2816 = sst [smem:[#allocation57_spill]] %s2800_s14 }
   0xb   :  { %20 = vsyncpa [#allocation5], 0 }
   0xc   :  { %22 = vsyncpa [#allocation5 + $0x1], 0 }
   0xd   :  { %23 = vsyncpa [#allocation8], 0 }
   0xe   :  { %24 = vsyncpa [#allocation11], 0 }
   0xf   :  { %25 = vsyncpa [#allocation14], 0 }
  0x10   :  { %26 = vsyncpa [#allocation17], 0 }
  0x11   :  { %27 = vsyncpa [#allocation6], 0 }
  0x12   :  { %29 = vsyncpa [#allocation6 + $0x1], 0 }
  0x13   :  { %30 = vsyncpa [#allocation20], 0  ;;  %s2197_s29 = smov 0   ;;  %s2199_s30 = smov 0  }
  0x14   :  { %s2201_s15 = smov 0   ;;  %s2203_s16 = smov 0  }
  0x15 LB: > { %s2817_s1 = sld [smem:[#allocation48_spill]]  ;;  %s2221_s20 = sadd.s32 4294967295, %s2093_s16   ;;  %s2093_s16 = sphi %s2203_s16, %s2883_s16   ;;  %s2089_s15 = sphi %s2201_s15, %s2882_s15   ;;  %s2085_s30 = sphi %s2199_s30, %s2881_s30   ;;  %s2081_s29 = sphi %s2197_s29, %s2880_s29  }
  0x16   : > { %p1398_p0 = scmp.ge.s32.totalorder %s2093_s16, 1  ;;  %p57_p1 = scmp.eq.s32.totalorder %s2221_s20, 0 }
  0x17   : > { %p366_p2 = scmp.lt.s32.totalorder %s2093_s16, 4  ;;  %s2107_s22 = smov [#allocation7]  }
  0x18   : > { %s380_s23 = sshll.u32 %s2107_s22, 4  ;;  %s2819_s3 = sld [smem:[#allocation50_spill]]  ;;  %s381_s23 = int_to_ptr.vmem [resolvable:$true] %s380_s23 }
  0x19   : > { %p2227_p4 = pnand %p1398_p0, %p366_p2  ;;  %s2108_s28 = smov [#allocation10]  }
  0x1a   : > { %s403_s17 = sshll.u32 %s2108_s28, 4  ;;  %s2802_s18 = smov 128   ;;  %s404_s17 = int_to_ptr.vmem [resolvable:$true] %s403_s17 }
  0x1b   : > { %s378_s19 = sshll.u32 %s2817_s1, 4  ;;  %p1557_p5 = pneg %p2227_p4  ;;  %s379_s19 = int_to_ptr.hbm [resolvable:$true] %s378_s19 }
  0x1c   : > { %s2804_s22 = smov 8   ;;  %s2821_s7 = sld [smem:[#allocation52_spill]] }
  0x1d   : > { %p2238_p6 = pnand %p1557_p5, %p57_p1  ;;  %s2822_s2 = sld [smem:[#allocation49_spill]] }
  0x1e   : > { %s401_s26 = sshll.u32 %s2819_s3, 4  ;;  %s2111_s3 = smov [#allocation13]   ;;  %s402_s26 = int_to_ptr.hbm [resolvable:$true] %s401_s26 }
  0x1f   : > { %1560 = dma.hbm_to_vmem [thread:$0]  (!%p2238_p6), %s379_s19, 128, %s381_s23, [#allocation8]  }
  0x20   : > { %1566 = dma.hbm_to_vmem [thread:$0]  (!%p2238_p6), %s402_s26, 2048, %s404_s17, [#allocation11], %s2802_s18, %s2802_s18, %s2804_s22  }
  0x21   : > { %s437_s12 = sshll.u32 %s2111_s3, 4  ;;  %s2112_s23 = smov 512   ;;  %s438_s12 = int_to_ptr.vmem [resolvable:$true] %s437_s12 }
  0x22   : > { %s435_s1 = sshll.u32 %s2821_s7, 4  ;;  %s2113_s14 = smov 32   ;;  %s436_s1 = int_to_ptr.hbm [resolvable:$true] %s435_s1 }
  0x23   : > { %s390_s19 = sshll.u32 %s2822_s2, 4  ;;  %s2114_s26 = smov [#allocation9]   ;;  %s391_s19 = int_to_ptr.hbm [resolvable:$true] %s390_s19 }
  0x24   : > { %1572 = dma.hbm_to_vmem [thread:$0]  (!%p2238_p6), %s436_s1, 8192, %s438_s12, [#allocation14], %s2112_s23, %s2112_s23, %s2113_s14  }
  0x25   : > { %s392_s17 = sshll.u32 %s2114_s26, 4  ;;  %s2823_s5 = sld [smem:[#allocation51_spill]]  ;;  %s393_s17 = int_to_ptr.vmem [resolvable:$true] %s392_s17 }
  0x26   : > { %1563 = dma.hbm_to_vmem [thread:$0]  (!%p2238_p6), %s391_s19, 128, %s393_s17, [#allocation8]  }
  0x27   : > { %s2824_s9 = sld [smem:[#allocation53_spill]]  ;;  %s2115_s22 = smov [#allocation12]  }
  0x28   : > { %s420_s1 = sshll.u32 %s2115_s22, 4  ;;  %s2825_s12 = smov 8   ;;  %s421_s1 = int_to_ptr.vmem [resolvable:$true] %s420_s1 }
  0x29   : > { %s2826_s18 = smov 128   ;;  %s2116_s19 = smov [#allocation15]  }
  0x2a   : > { %s454_s26 = sshll.u32 %s2116_s19, 4  ;;  %s2827_s10 = sld [smem:[#allocation54_spill]]  ;;  %s455_s26 = int_to_ptr.vmem [resolvable:$true] %s454_s26 }
  0x2b   : > { %s418_s25 = sshll.u32 %s2823_s5, 4  ;;  %s2117_s3 = smov [#allocation16]   ;;  %s419_s25 = int_to_ptr.hbm [resolvable:$true] %s418_s25 }
  0x2c   : > { %1569 = dma.hbm_to_vmem [thread:$0]  (!%p2238_p6), %s419_s25, 2048, %s421_s1, [#allocation11], %s2826_s18, %s2826_s18, %s2825_s12  }
  0x2d   : > { %s452_s28 = sshll.u32 %s2824_s9, 4  ;;  %s468_s11 = sshll.u32 %s2117_s3, 4  ;;  %s453_s28 = int_to_ptr.hbm [resolvable:$true] %s452_s28  ;;  %s469_s11 = int_to_ptr.vmem [resolvable:$true] %s468_s11 }
  0x2e   : > { %1575 = dma.hbm_to_vmem [thread:$0]  (!%p2238_p6), %s453_s28, 8192, %s455_s26, [#allocation14], %s2112_s23, %s2112_s23, %s2113_s14  }
  0x2f   : > { %s1397_s25 = sadd.s32 4294967294, %s2093_s16   ;;  %s2282_s1 = sadd.s32 1, %s2093_s16  }
  0x30   : > { %s466_s22 = sshll.u32 %s2827_s10, 4  ;;  %s43_s19 = sadd.s32 1, %s2089_s15  ;;  %s467_s22 = int_to_ptr.hbm [resolvable:$true] %s466_s22 }
  0x31   : > { %1578 = dma.hbm_to_vmem [thread:$0]  (!%p2238_p6), %s467_s22, 2048, %s469_s11, [#allocation17], %s2826_s18, %s2826_s18, %s2825_s12  }
  0x32   : > { %s40_s17 = ssub.s32 %s2093_s16, %s2282_s1  ;;  %p50_p7 = scmp.ne.s32.totalorder %s2089_s15, %s2085_s30 }
  0x33   : > { %p41_p8 = scmp.eq.s32.totalorder %s40_s17, 0  ;;  %p51_p9 = scmp.eq.s32.totalorder %s2093_s16, 0 }
  0x34   : > { %p56_p10 = scmp.ne.s32.totalorder %s2085_s30, %s2081_s29  ;;  %p2806_p11 = scmp.eq.s32.totalorder %s2221_s20, 2 }
  0x35   : > { %s2294_s14 = scalar_select %p41_p8, %s2089_s15, %s43_s19  }
  0x36   : > { %p2298_p12 = por %p57_p1, %p56_p10  ;;  %p2304_p13 = por %p2806_p11, %p50_p7 }
  0x37   : > { %p317_p0 = scmp.eq.s32.totalorder %s1397_s25, 2  ;;  %p52_p2 = por %p51_p9, %p50_p7 }
  0x38   : > { %s485_s28 = sand.u32 1, %s2089_s15   ;;  %p1594_p6 = scmp.lt.s32.totalorder %s2093_s16, 3 }
  0x39   : > { %p2309_p5 = por %p317_p0, %p56_p10  ;;  %s1407_s24 = sshll.u32 %s485_s28, 5 }
  0x3a   : > { %s1434_s22 = sshll.u32 %s2093_s16, 5  ;;  %s489_s2 = scalar_lea.vmem [#allocation4], %s1407_s24 }
  0x3b   : > { %s494_s19 = scalar_lea.hbm %s2786_s0, %s1434_s22  ;;  %s497_s5 = sshll.u32 %s489_s2, 4  ;;  %s498_s5 = int_to_ptr.vmem [resolvable:$true] %s497_s5 }
  0x3c   : > { %s495_s17 = sshll.u32 %s494_s19, 4  ;;  %p2318_p8 = pnand %p1594_p6, %p52_p2  ;;  %s496_s17 = int_to_ptr.hbm [resolvable:$true] %s495_s17 }
  0x3d   : > { %s486_s7 = scalar_lea.sflag [#allocation5], %s485_s28  ;;  %s1909_s9 = sshra.s32 %s496_s17, 4  ;;  %s1910_s9 = int_to_ptr.hbm [resolvable:$true] %s1909_s9 }
  0x3e   : > { %s1911_s10 = scalar_lea.hbm %s1910_s9, 32  ;;  %p1913_p9 = pneg %p2318_p8 }
  0x3f   : > { %p1912_p7 = scmp.ne.s32.totalorder %s1910_s9, %s1911_s10  ;;  %s1916_s2 = scalar_lea.hbm %s2786_s0, 96 }
  0x40   : > { %p1917_p2 = scmp.lt.s32.totalorder %s1910_s9, %s2786_s0  ;;  %p1918_p6 = scmp.lt.s32.totalorder %s1916_s2, %s1911_s10 }
  0x41   : > { %p1914_p10 = pnand %p1913_p9, %p1912_p7 }
  0x42   : > { %p1919_p11 = por %p1918_p6, %p1917_p2 }
  0x43   : > { %p1915_p0 = pneg %p1914_p10 }
  0x45   : > { %p1920_p3 = pnand %p1919_p11, %p1915_p0 }
  0x47   : > { %1923 = shalt.err (!%p1920_p3)
}
  0x48   : > { %1582 = dma.hbm_to_vmem [thread:$0]  (!%p2318_p8), %s496_s17, 512, %s498_s5, %s486_s7, %s2826_s18, %s2826_s18, %s2825_s12  }
  0x49   : > { %509 = sbr.rel (%p2227_p4) target bundleno = 933 (0x3a5), region = 68 }
  0x4e   : > { %s2338_s28 = sand.u32 1, %s2085_s30  }
  0x4f   : > { %s1411_s9 = sshll.u32 %s2338_s28, 5  ;;  %s512_s10 = scalar_lea.sflag [#allocation5], %s2338_s28 }
  0x50   : > { %s2342_s19 = scalar_lea.vmem [#allocation4], %s1411_s9 }
  0x51   : > { %2052 = dma.done.wait (%p2298_p12), %s512_s10, 512  }
  0x52   : > { %2054 = vsyncadd (%p2298_p12), %s512_s10, 4294966784 }
  0x53   : > { %2056 = dma.done.wait (%p57_p1), [#allocation8], 256  }
  0x54   : > { %2058 = vsyncadd (%p57_p1), [#allocation8], 4294967040 }
  0x55   : > { %2060 = dma.done.wait (%p57_p1), [#allocation11], 4096  }
  0x56   : > { %2062 = vsyncadd (%p57_p1), [#allocation11], 4294963200 }
  0x57   : > { %2064 = dma.done.wait (%p57_p1), [#allocation14], 16384  }
  0x58   : > { %2066 = vsyncadd (%p57_p1), [#allocation14], 4294950912 }
  0x59   : > { %2068 = dma.done.wait (%p57_p1), [#allocation17], 2048  }
  0x5a   : > { %2070 = vsyncadd (%p57_p1), [#allocation17], 4294965248  ;;  %s2364_s5 = scalar_lea.vmem [#allocation18], %s1411_s9  ;;  %p2832_p3 = scmp.ne.s32.totalorder %s2221_s20, 0 }
  0x5c   : > { %601 = sbr.rel (%p2832_p3) target bundleno = 100 (0x64), region = 104 }
  0x61   : > { %v602_v0 = vld [vmem:[#allocation7] sm:$0xff]  ;;  %v604_v1 = vld [vmem:[#allocation9] sm:$0xff] }
  0x62   : > { %603 = vst [vmem:[#allocation19] sm:$0xff] %v602_v0 }
  0x63   : > { %605 = vst [vmem:[#allocation21] sm:$0xff] %v604_v1 }
  0x64 PF: > { %v625_v2 = vld [vmem:[#allocation10 + $0x78] sm:$0xff]  ;;  %v624_v3 = vld [vmem:[#allocation10 + $0x70] sm:$0xff]  ;;  %v623_v4 = vld [vmem:[#allocation10 + $0x68] sm:$0xff]  ;;  %s2639_s25 = smov 0  }
  0x65   : > { %630 = vmatpush.msra.mxu0 %v625_v2  ;;  %v622_v5 = vld [vmem:[#allocation10 + $0x60] sm:$0xff]  ;;  %v621_v6 = vld [vmem:[#allocation10 + $0x58] sm:$0xff]  ;;  %v620_v7 = vld [vmem:[#allocation10 + $0x50] sm:$0xff] }
  0x66   : > { %v619_v8 = vld [vmem:[#allocation10 + $0x48] sm:$0xff]  ;;  %v618_v9 = vld [vmem:[#allocation10 + $0x40] sm:$0xff]  ;;  %v617_v10 = vld [vmem:[#allocation10 + $0x38] sm:$0xff] }
  0x67   : > { %631 = vmatpush.msra.mxu0 %v624_v3  ;;  %v616_v11 = vld [vmem:[#allocation10 + $0x30] sm:$0xff]  ;;  %v615_v12 = vld [vmem:[#allocation10 + $0x28] sm:$0xff]  ;;  %v614_v13 = vld [vmem:[#allocation10 + $0x20] sm:$0xff] }
  0x68   : > { %v613_v14 = vld [vmem:[#allocation10 + $0x18] sm:$0xff]  ;;  %v612_v15 = vld [vmem:[#allocation10 + $0x10] sm:$0xff]  ;;  %v611_v18 = vld [vmem:[#allocation10 + $0x8] sm:$0xff] }
  0x69   : > { %632 = vmatpush.msra.mxu0 %v623_v4  ;;  %v678_v16 = vld [vmem:[#allocation12 + $0x78] sm:$0xff]  ;;  %v677_v17 = vld [vmem:[#allocation12 + $0x70] sm:$0xff]  ;;  %v676_v19 = vld [vmem:[#allocation12 + $0x68] sm:$0xff] }
  0x6a   : > { %683 = vmatpush.msra.mxu1 %v678_v16  ;;  %v610_v20 = vld [vmem:[#allocation10] sm:$0xff]  ;;  %v606_v22 = vld [vmem:[%s2342_s19] sm:$0xff]  ;;  %v674_v23 = vld [vmem:[#allocation12 + $0x58] sm:$0xff] }
  0x6b   : > { %633 = vmatpush.msra.mxu0 %v622_v5  ;;  %v675_v21 = vld [vmem:[#allocation12 + $0x60] sm:$0xff]  ;;  %v673_v24 = vld [vmem:[#allocation12 + $0x50] sm:$0xff]  ;;  %v672_v25 = vld [vmem:[#allocation12 + $0x48] sm:$0xff] }
  0x6c   : > { %684 = vmatpush.msra.mxu1 %v677_v17  ;;  %v671_v26 = vld [vmem:[#allocation12 + $0x40] sm:$0xff]  ;;  %v607_v27 = vld [vmem:[%s2342_s19 + $0x8] sm:$0xff]  ;;  %v669_v29 = vld [vmem:[#allocation12 + $0x30] sm:$0xff] }
  0x6d   : > { %634 = vmatpush.msra.mxu0 %v621_v6  ;;  %v670_v28 = vld [vmem:[#allocation12 + $0x38] sm:$0xff]  ;;  %v668_v30 = vld [vmem:[#allocation12 + $0x28] sm:$0xff]  ;;  %v667_v31 = vld [vmem:[#allocation12 + $0x20] sm:$0xff] }
  0x6e   : > { %685 = vmatpush.msra.mxu1 %v676_v19  ;;  %v608_v32 = vld [vmem:[%s2342_s19 + $0x10] sm:$0xff]  ;;  %v666_v33 = vld [vmem:[#allocation12 + $0x18] sm:$0xff]  ;;  %v609_v34 = vld [vmem:[%s2342_s19 + $0x18] sm:$0xff] }
  0x6f   : > { %635 = vmatpush.msra.mxu0 %v620_v7  ;;  %v665_v35 = vld [vmem:[#allocation12 + $0x10] sm:$0xff]  ;;  %v664_v36 = vld [vmem:[#allocation12 + $0x8] sm:$0xff]  ;;  %v663_v37 = vld [vmem:[#allocation12] sm:$0xff] }
  0x70   : > { %686 = vmatpush.msra.mxu1 %v675_v21  ;;  %v2375_v38 = vld [vmem:[%s2790_s4] ss:$0 sm:$0xff]  ;;  %v776_v39 = vld [vmem:[#allocation13 + $0x1e0] sm:$0xff]  ;;  %v777_v40 = vld [vmem:[#allocation13 + $0x1e8] sm:$0xff] }
  0x71   : > { %636 = vmatpush.msra.mxu0 %v619_v8  ;;  %v2377_v41 = vld [vmem:[#allocation13 + $0x1f0] sm:$0xff]  ;;  %790 = vmatpush.msra.mxu2 %v776_v39  ;;  %v2379_v42 = vld [vmem:[#allocation13 + $0x1f8] sm:$0xff]  ;;  %v772_v43 = vld [vmem:[#allocation13 + $0x1c0] sm:$0xff] }
  0x72   : > { %687 = vmatpush.msra.mxu1 %v674_v23  ;;  %819 = vmatpush.msra.mxu3 %v777_v40  ;;  %v773_v44 = vld [vmem:[#allocation13 + $0x1c8] sm:$0xff]  ;;  %v2383_v45 = vld [vmem:[#allocation13 + $0x1d0] sm:$0xff]  ;;  %v2385_v46 = vld [vmem:[#allocation13 + $0x1d8] sm:$0xff] }
  0x73   : > { %637 = vmatpush.msra.mxu0 %v618_v9  ;;  %v768_v47 = vld [vmem:[#allocation13 + $0x1a0] sm:$0xff]  ;;  %791 = vmatpush.msra.mxu2 %v772_v43  ;;  %v769_v49 = vld [vmem:[#allocation13 + $0x1a8] sm:$0xff]  ;;  %v2387_v50 = vld [vmem:[#allocation13 + $0x1b0] sm:$0xff] }
  0x74   : > { %688 = vmatpush.msra.mxu1 %v673_v24  ;;  %820 = vmatpush.msra.mxu3 %v773_v44  ;;  %v2389_v51 = vld [vmem:[#allocation13 + $0x1b8] sm:$0xff]  ;;  %v764_v53 = vld [vmem:[#allocation13 + $0x180] sm:$0xff]  ;;  %v765_v54 = vld [vmem:[#allocation13 + $0x188] sm:$0xff] }
  0x75   : > { %638 = vmatpush.msra.mxu0 %v617_v10  ;;  %792 = vmatpush.msra.mxu2 %v768_v47  ;;  %v2394_v55 = vld [vmem:[#allocation13 + $0x190] sm:$0xff]  ;;  %v2398_v57 = vld [vmem:[#allocation13 + $0x198] sm:$0xff]  ;;  %v760_v58 = vld [vmem:[#allocation13 + $0x160] sm:$0xff] }
  0x76   : > { %689 = vmatpush.msra.mxu1 %v672_v25  ;;  %821 = vmatpush.msra.mxu3 %v769_v49  ;;  %v761_v59 = vld [vmem:[#allocation13 + $0x168] sm:$0xff]  ;;  %v2400_v60 = vld [vmem:[#allocation13 + $0x170] sm:$0xff]  ;;  %v2403_v61 = vld [vmem:[#allocation13 + $0x178] sm:$0xff] }
  0x77   : > { %639 = vmatpush.msra.mxu0 %v616_v11  ;;  %793 = vmatpush.msra.mxu2 %v764_v53  ;;  %v756_v62 = vld [vmem:[#allocation13 + $0x140] sm:$0xff]  ;;  %v757_v63 = vld [vmem:[#allocation13 + $0x148] sm:$0xff]  ;;  %v2406_v0 = vld [vmem:[#allocation13 + $0x150] sm:$0xff] }
  0x78   : > { %690 = vmatpush.msra.mxu1 %v671_v26  ;;  %822 = vmatpush.msra.mxu3 %v765_v54  ;;  %v2409_v1 = vld [vmem:[#allocation13 + $0x158] sm:$0xff]  ;;  %v752_v2 = vld [vmem:[#allocation13 + $0x120] sm:$0xff]  ;;  %v753_v4 = vld [vmem:[#allocation13 + $0x128] sm:$0xff] }
  0x79   : > { %640 = vmatpush.msra.mxu0 %v615_v12  ;;  %794 = vmatpush.msra.mxu2 %v760_v58  ;;  %v2412_v5 = vld [vmem:[#allocation13 + $0x130] sm:$0xff]  ;;  %v2416_v7 = vld [vmem:[#allocation13 + $0x138] sm:$0xff]  ;;  %v748_v8 = vld [vmem:[#allocation13 + $0x100] sm:$0xff] }
  0x7a   : > { %691 = vmatpush.msra.mxu1 %v670_v28  ;;  %823 = vmatpush.msra.mxu3 %v761_v59  ;;  %v749_v9 = vld [vmem:[#allocation13 + $0x108] sm:$0xff]  ;;  %v2420_v11 = vld [vmem:[#allocation13 + $0x110] sm:$0xff]  ;;  %v2422_v12 = vld [vmem:[#allocation13 + $0x118] sm:$0xff] }
  0x7b   : > { %641 = vmatpush.msra.mxu0 %v614_v13  ;;  %795 = vmatpush.msra.mxu2 %v756_v62  ;;  %v744_v13 = vld [vmem:[#allocation13 + $0xe0] sm:$0xff]  ;;  %v2427_v16 = vld [vmem:[#allocation13 + $0xf8] sm:$0xff]  ;;  %v2431_v19 = vld [vmem:[#allocation13 + $0xd0] sm:$0xff] }
  0x7c   : > { %692 = vmatpush.msra.mxu1 %v669_v29  ;;  %824 = vmatpush.msra.mxu3 %v757_v63  ;;  %v740_v17 = vld [vmem:[#allocation13 + $0xc0] sm:$0xff]  ;;  %v737_v23 = vld [vmem:[#allocation13 + $0xa8] sm:$0xff]  ;;  %v2438_v25 = vld [vmem:[#allocation13 + $0xb0] sm:$0xff] }
  0x7d   : > { %642 = vmatpush.msra.mxu0 %v613_v14  ;;  %796 = vmatpush.msra.mxu2 %v752_v2  ;;  %v745_v14 = vld [vmem:[#allocation13 + $0xe8] sm:$0xff]  ;;  %v2440_v26 = vld [vmem:[#allocation13 + $0xb8] sm:$0xff]  ;;  %v724_v40 = vld [vmem:[#allocation13 + $0x40] sm:$0xff] }
  0x7e   : > { %693 = vmatpush.msra.mxu1 %v668_v30  ;;  %825 = vmatpush.msra.mxu3 %v753_v4  ;;  %v733_v29 = vld [vmem:[#allocation13 + $0x88] sm:$0xff]  ;;  %v2444_v30 = vld [vmem:[#allocation13 + $0x90] sm:$0xff]  ;;  %v727_v47 = vld [vmem:[#allocation13 + $0x58] sm:$0xff] }
  0x7f   : > { %643 = vmatpush.msra.mxu0 %v612_v15  ;;  %797 = vmatpush.msra.mxu2 %v748_v8  ;;  %v2425_v15 = vld [vmem:[#allocation13 + $0xf0] sm:$0xff]  ;;  %v725_v43 = vld [vmem:[#allocation13 + $0x48] sm:$0xff]  ;;  %v723_v53 = vld [vmem:[#allocation13 + $0x38] sm:$0xff] }
  0x80   : > { %694 = vmatpush.msra.mxu1 %v667_v31  ;;  %826 = vmatpush.msra.mxu3 %v749_v9  ;;  %v2448_v31 = vld [vmem:[#allocation13 + $0x98] sm:$0xff]  ;;  %v726_v44 = vld [vmem:[#allocation13 + $0x50] sm:$0xff]  ;;  %v721_v49 = vld [vmem:[#allocation13 + $0x28] sm:$0xff] }
  0x81   : > { %644 = vmatpush.msra.mxu0 %v611_v18  ;;  %v741_v18 = vld [vmem:[#allocation13 + $0xc8] sm:$0xff]  ;;  %798 = vmatpush.msra.mxu2 %v744_v13  ;;  %v719_v58 = vld [vmem:[#allocation13 + $0x18] sm:$0xff] }
  0x82   : > { %695 = vmatpush.msra.mxu1 %v666_v33  ;;  %827 = vmatpush.msra.mxu3 %v745_v14  ;;  %v729_v33 = vld [vmem:[#allocation13 + $0x68] sm:$0xff] }
  0x83   : > { %645 = vmatpush.msra.mxu0 %v610_v20  ;;  %v2433_v20 = vld [vmem:[#allocation13 + $0xd8] sm:$0xff]  ;;  %799 = vmatpush.msra.mxu2 %v740_v17  ;;  %v717_v54 = vld [vmem:[#allocation13 + $0x8] sm:$0xff] }
  0x84   : > { %646 = vmatmul.f32.vlgmr.msra.gmra.mxu0 %v606_v22  ;;  %696 = vmatpush.msra.mxu1 %v665_v35  ;;  %v736_v22 = vld [vmem:[#allocation13 + $0xa0] sm:$0xff]  ;;  %v731_v35 = vld [vmem:[#allocation13 + $0x78] sm:$0xff] }
  0x85   : > { %848 = vmatpush.msrb.mxu0 %v2377_v41  ;;  %828 = vmatpush.msra.mxu3 %v741_v18 }
  0x86   : > { %697 = vmatpush.msra.mxu1 %v664_v36  ;;  %800 = vmatpush.msra.mxu2 %v736_v22  ;;  %v2501_v22 = vld [vmem:[#allocation15 + $0x8] sm:$0xff] }
  0x87   : > { %849 = vmatpush.msrb.mxu0 %v2383_v45  ;;  %829 = vmatpush.msra.mxu3 %v737_v23  ;;  %2834 = vst [vmem:[#allocation30_spill] sm:$0xff] %v2501_v22  ;;  %v2503_v23 = vld [vmem:[#allocation15 + $0x10] sm:$0xff] }
  0x88   : > { %698 = vmatpush.msra.mxu1 %v663_v37  ;;  %2835 = vst [vmem:[#allocation31_spill] sm:$0xff] %v2503_v23  ;;  %v2623_v23 = vld [vmem:[#allocation15 + $0x1e0] sm:$0xff]  ;;  %v2627_v22 = vld [vmem:[#allocation15 + $0x1f0] sm:$0xff] }
  0x89   : > { %850 = vmatpush.msrb.mxu0 %v2387_v50  ;;  %830 = vmatpush.msra.mxu3 %v733_v29  ;;  %v2515_v29 = vld [vmem:[#allocation15 + $0x40] sm:$0xff] }
  0x8a   : > { %877 = vmatpush.msrb.mxu1 %v2379_v42  ;;  %2841 = vst [vmem:[#allocation37_spill] sm:$0xff] %v2515_v29 }
  0x8b   : > { %851 = vmatpush.msrb.mxu0 %v2394_v55  ;;  %831 = vmatpush.msra.mxu3 %v729_v33 }
  0x8c   : > { %649 = vmatmul.f32.gmra.mxu0 %v607_v27  ;;  %878 = vmatpush.msrb.mxu1 %v2385_v46  ;;  %v732_v27 = vld [vmem:[#allocation13 + $0x80] sm:$0xff] }
  0x8d   : > { %852 = vmatpush.msrb.mxu0 %v2400_v60  ;;  %801 = vmatpush.msra.mxu2 %v732_v27  ;;  %v2511_v27 = vld [vmem:[#allocation15 + $0x30] sm:$0xff] }
  0x8e   : > { %879 = vmatpush.msrb.mxu1 %v2389_v51  ;;  %832 = vmatpush.msra.mxu3 %v725_v43  ;;  %2839 = vst [vmem:[#allocation35_spill] sm:$0xff] %v2511_v27  ;;  %v2531_v43 = vld [vmem:[#allocation15 + $0x78] sm:$0xff] }
  0x8f   : > { %853 = vmatpush.msrb.mxu0 %v2406_v0 }
  0x90   : > { %880 = vmatpush.msrb.mxu1 %v2398_v57  ;;  %833 = vmatpush.msra.mxu3 %v721_v49  ;;  %v2539_v49 = vld [vmem:[#allocation15 + $0x98] sm:$0xff] }
  0x91   : > { %854 = vmatpush.msrb.mxu0 %v2412_v5 }
  0x92   : > { %881 = vmatpush.msrb.mxu1 %v2403_v61  ;;  %834 = vmatpush.msra.mxu3 %v717_v54  ;;  %v2547_v54 = vld [vmem:[#allocation15 + $0xb8] sm:$0xff] }
  0x93   : > { %855 = vmatpush.msrb.mxu0 %v2420_v11 }
  0x94   : > { %652 = vmatmul.f32.gmra.mxu0 %v608_v32  ;;  %882 = vmatpush.msrb.mxu1 %v2409_v1  ;;  %v728_v32 = vld [vmem:[#allocation13 + $0x60] sm:$0xff] }
  0x95   : > { %856 = vmatpush.msrb.mxu0 %v2425_v15  ;;  %802 = vmatpush.msra.mxu2 %v728_v32  ;;  %v2521_v32 = vld [vmem:[#allocation15 + $0x58] sm:$0xff] }
  0x96   : > { %883 = vmatpush.msrb.mxu1 %v2416_v7  ;;  %1453 = vmatpush.msrb.mxu3 %v2379_v42  ;;  %2844 = vst [vmem:[#allocation40_spill] sm:$0xff] %v2521_v32 }
  0x97   : > { %857 = vmatpush.msrb.mxu0 %v2431_v19  ;;  %803 = vmatpush.msra.mxu2 %v724_v40 }
  0x98   : > { %884 = vmatpush.msrb.mxu1 %v2422_v12  ;;  %1454 = vmatpush.msrb.mxu3 %v2385_v46 }
  0x99   : > { %858 = vmatpush.msrb.mxu0 %v2438_v25 }
  0x9a   : > { %885 = vmatpush.msrb.mxu1 %v2427_v16  ;;  %1455 = vmatpush.msrb.mxu3 %v2389_v51 }
  0x9b   : > { %859 = vmatpush.msrb.mxu0 %v2444_v30 }
  0x9c   : > { %655 = vmatmul.f32.gmra.mxu0 %v609_v34  ;;  %886 = vmatpush.msrb.mxu1 %v2433_v20  ;;  %v730_v34 = vld [vmem:[#allocation13 + $0x70] sm:$0xff] }
  0x9d   : > { %860 = vmatpush.msrb.mxu0 %v730_v34  ;;  %1456 = vmatpush.msrb.mxu3 %v2398_v57 }
  0x9e   : > { %887 = vmatpush.msrb.mxu1 %v2440_v26 }
  0x9f   : > { %861 = vmatpush.msrb.mxu0 %v726_v44  ;;  %1457 = vmatpush.msrb.mxu3 %v2403_v61 }
  0xa0   : > { %888 = vmatpush.msrb.mxu1 %v2448_v31 }
  0xa1   : > { %1458 = vmatpush.msrb.mxu3 %v2409_v1 }
  0xa2   : > { %889 = vmatpush.msrb.mxu1 %v731_v35 }
  0xa3   : > { %1459 = vmatpush.msrb.mxu3 %v2416_v7 }
  0xa4   : > { %890 = vmatpush.msrb.mxu1 %v727_v47 }
  0xa5   : > { %1460 = vmatpush.msrb.mxu3 %v2422_v12 }
  0xa6   : > { %891 = vmatpush.msrb.mxu1 %v723_v53 }
  0xa7   : > { %1461 = vmatpush.msrb.mxu3 %v2427_v16 }
  0xa8   : > { %892 = vmatpush.msrb.mxu1 %v719_v58 }
  0xa9   : > { %1462 = vmatpush.msrb.mxu3 %v2433_v20 }
  0xab   : > { %1463 = vmatpush.msrb.mxu3 %v2440_v26  ;;  %v2509_v26 = vld [vmem:[#allocation15 + $0x28] sm:$0xff] }
  0xac   : > { %2838 = vst [vmem:[#allocation34_spill] sm:$0xff] %v2509_v26  ;;  %v986_v26 = vld [vmem:[#allocation19] sm:$0xff]  }
  0xad   : > { %1464 = vmatpush.msrb.mxu3 %v2448_v31  ;;  %v2519_v31 = vld [vmem:[#allocation15 + $0x50] sm:$0xff] }
  0xae   : > { %2843 = vst [vmem:[#allocation39_spill] sm:$0xff] %v2519_v31 }
  0xaf   : > { %1465 = vmatpush.msrb.mxu3 %v731_v35  ;;  %v2523_v35 = vld [vmem:[#allocation15 + $0x60] sm:$0xff] }
  0xb1   : > { %1466 = vmatpush.msrb.mxu3 %v727_v47  ;;  %v2535_v47 = vld [vmem:[#allocation15 + $0x88] sm:$0xff] }
  0xb3   : > { %1467 = vmatpush.msrb.mxu3 %v723_v53  ;;  %v2543_v53 = vld [vmem:[#allocation15 + $0xa8] sm:$0xff] }
  0xb5   : > { %1468 = vmatpush.msrb.mxu3 %v719_v58  ;;  %v2551_v58 = vld [vmem:[#allocation15 + $0xc8] sm:$0xff] }
 0x101   : > { %v647_v48 = vpop.f32.mrf.mxu0 }
 0x102   : > { %v648_v52 = vadd.f32 %v2375_v38, %v647_v48  ;;  %v720_v48 = vld [vmem:[#allocation13 + $0x20] sm:$0xff] }
 0x103   : > { %804 = vmatpush.msra.mxu2 %v720_v48  ;;  %v2537_v48 = vld [vmem:[#allocation15 + $0x90] sm:$0xff] }
 0x104   : > { %v659_v56 = vmax.f32 %v648_v52, 0.0  ;;  %v722_v52 = vld [vmem:[#allocation13 + $0x30] sm:$0xff] }
 0x105   : > { %862 = vmatpush.msrb.mxu0 %v722_v52 }
 0x106   : > { %699 = vmatmul.f32.vlgmr.msra.gmra.mxu1 %v659_v56  ;;  %v718_v56 = vld [vmem:[#allocation13 + $0x10] sm:$0xff] }
 0x107   : > { %863 = vmatpush.msrb.mxu0 %v718_v56 }
 0x109   : > { %v650_v3 = vpop.f32.mrf.mxu0 }
 0x10a   : > { %v651_v6 = vadd.f32 %v2375_v38, %v650_v3 }
 0x10c   : > { %v660_v10 = vmax.f32 %v651_v6, 0.0 }
 0x10e   : > { %702 = vmatmul.f32.gmra.mxu1 %v660_v10 }
 0x111   : > { %v653_v21 = vpop.f32.mrf.mxu0 }
 0x112   : > { %v654_v24 = vadd.f32 %v2375_v38, %v653_v21  ;;  %v2499_v21 = vld [vmem:[#allocation15] sm:$0xff] }
 0x113   : > { %2833 = vst [vmem:[#allocation29_spill] sm:$0xff] %v2499_v21 }
 0x114   : > { %v661_v28 = vmax.f32 %v654_v24, 0.0  ;;  %v2505_v24 = vld [vmem:[#allocation15 + $0x18] sm:$0xff] }
 0x115   : > { %2836 = vst [vmem:[#allocation32_spill] sm:$0xff] %v2505_v24  ;;  %v2625_v24 = vld [vmem:[#allocation15 + $0x1e8] sm:$0xff] }
 0x116   : > { %705 = vmatmul.f32.gmra.mxu1 %v661_v28  ;;  %v2513_v28 = vld [vmem:[#allocation15 + $0x38] sm:$0xff] }
 0x117   : > { %2840 = vst [vmem:[#allocation36_spill] sm:$0xff] %v2513_v28  ;;  %v2631_v28 = vld [vmem:[#allocation15 + $0x1f8] sm:$0xff] }
 0x119   : > { %v656_v36 = vpop.f32.mrf.mxu0 }
 0x11a   : > { %v657_v37 = vadd.f32 %v2375_v38, %v656_v36  ;;  %v716_v38 = vld [vmem:[#allocation13] sm:$0xff]  ;;  %v2525_v36 = vld [vmem:[#allocation15 + $0x68] sm:$0xff] }
 0x11b   : > { %805 = vmatpush.msra.mxu2 %v716_v38  ;;  %v2545_v38 = vld [vmem:[#allocation15 + $0xb0] sm:$0xff] }
 0x11c   : > { %v662_v39 = vmax.f32 %v657_v37, 0.0  ;;  %v2527_v37 = vld [vmem:[#allocation15 + $0x70] sm:$0xff] }
 0x11d   : > { %1437 = vmatpush.msrb.mxu2 %v2377_v41  ;;  %v1679_v41 = vld [vmem:[%s2792_s6] ss:$0 sm:$0xff] }
 0x11e   : > { %708 = vmatmul.f32.gmra.mxu1 %v662_v39 }
 0x11f   : > { %1438 = vmatpush.msrb.mxu2 %v2383_v45 }
 0x121   : > { %1439 = vmatpush.msrb.mxu2 %v2387_v50 }
 0x123   : > { %1440 = vmatpush.msrb.mxu2 %v2394_v55 }
 0x125   : > { %1441 = vmatpush.msrb.mxu2 %v2400_v60 }
 0x127   : > { %1442 = vmatpush.msrb.mxu2 %v2406_v0  ;;  %v780_v0 = vld [vmem:[%s2794_s8] sm:$0xf] }
 0x128   : > { %v2483_v1 = vperm.slane %v780_v0, 2  ;;  %v2485_v2 = vperm.slane %v780_v0, 3  ;;  %v2489_v7 = vperm.slane %v780_v0, 0  ;;  %v2491_v8 = vperm.slane %v780_v0, 1  ;;  %v2575_v0 = vld [vmem:[#allocation15 + $0x128] sm:$0xff] }
 0x129   : > { %1443 = vmatpush.msrb.mxu2 %v2412_v5  ;;  %2845 = vst [vmem:[#allocation41_spill] sm:$0xff] %v2575_v0 }
 0x12b   : > { %1444 = vmatpush.msrb.mxu2 %v2420_v11 }
 0x12d   : > { %1445 = vmatpush.msrb.mxu2 %v2425_v15 }
 0x12f   : > { %1446 = vmatpush.msrb.mxu2 %v2431_v19 }
 0x131   : > { %1447 = vmatpush.msrb.mxu2 %v2438_v25  ;;  %v2507_v25 = vld [vmem:[#allocation15 + $0x20] sm:$0xff] }
 0x132   : > { %2837 = vst [vmem:[#allocation33_spill] sm:$0xff] %v2507_v25  ;;  %v987_v25 = vld [vmem:[#allocation21] sm:$0xff]  }
 0x133   : > { %1448 = vmatpush.msrb.mxu2 %v2444_v30  ;;  %v2517_v30 = vld [vmem:[#allocation15 + $0x48] sm:$0xff] }
 0x134   : > { %2842 = vst [vmem:[#allocation38_spill] sm:$0xff] %v2517_v30 }
 0x135   : > { %1449 = vmatpush.msrb.mxu2 %v730_v34 }
 0x137   : > { %1450 = vmatpush.msrb.mxu2 %v726_v44  ;;  %v2533_v44 = vld [vmem:[#allocation15 + $0x80] sm:$0xff] }
 0x139   : > { %1451 = vmatpush.msrb.mxu2 %v722_v52  ;;  %v2541_v52 = vld [vmem:[#allocation15 + $0xa0] sm:$0xff] }
 0x13b   : > { %1452 = vmatpush.msrb.mxu2 %v718_v56  ;;  %v2549_v56 = vld [vmem:[#allocation15 + $0xc0] sm:$0xff] }
 0x183   : > { %v700_v42 = vpop.f32.mrf.mxu1 }
 0x184   : > { %v701_v45 = vadd.f32 %v1679_v41, %v700_v42  ;;  %v2555_v42 = vld [vmem:[#allocation15 + $0xd8] sm:$0xff] }
 0x186   : > { %v712_v46 = vmax.f32 %v701_v45, 0.0  ;;  %v2557_v45 = vld [vmem:[#allocation15 + $0xe0] sm:$0xff] }
 0x188   : > { %806 = vmatmul.f32.vlgmr.msra.gmra.mxu2 %v712_v46  ;;  %835 = vmatmul.f32.vlgmr.msra.gmra.mxu3 %v712_v46 }
 0x189   : > { %864 = vmatmul.f32.vlgmr.msrb.gmra.mxu0 %v712_v46  ;;  %893 = vmatmul.f32.vlgmr.msrb.gmra.mxu1 %v712_v46  ;;  %v2559_v46 = vld [vmem:[#allocation15 + $0xe8] sm:$0xff] }
 0x18b   : > { %v703_v50 = vpop.f32.mrf.mxu1 }
 0x18c   : > { %v704_v51 = vadd.f32 %v1679_v41, %v703_v50  ;;  %v2561_v50 = vld [vmem:[#allocation15 + $0xf0] sm:$0xff] }
 0x18e   : > { %v713_v55 = vmax.f32 %v704_v51, 0.0  ;;  %v2563_v51 = vld [vmem:[#allocation15 + $0xf8] sm:$0xff] }
 0x190   : > { %809 = vmatmul.f32.gmra.mxu2 %v713_v55  ;;  %838 = vmatmul.f32.gmra.mxu3 %v713_v55 }
 0x191   : > { %867 = vmatmul.f32.gmra.mxu0 %v713_v55  ;;  %896 = vmatmul.f32.gmra.mxu1 %v713_v55  ;;  %v2565_v55 = vld [vmem:[#allocation15 + $0x100] sm:$0xff] }
 0x193   : > { %v706_v57 = vpop.f32.mrf.mxu1 }
 0x194   : > { %v707_v59 = vadd.f32 %v1679_v41, %v706_v57  ;;  %v2567_v57 = vld [vmem:[#allocation15 + $0x108] sm:$0xff] }
 0x196   : > { %v714_v60 = vmax.f32 %v707_v59, 0.0  ;;  %v2569_v59 = vld [vmem:[#allocation15 + $0x110] sm:$0xff] }
 0x198   : > { %812 = vmatmul.f32.gmra.mxu2 %v714_v60  ;;  %841 = vmatmul.f32.gmra.mxu3 %v714_v60 }
 0x19b   : > { %v709_v61 = vpop.f32.mrf.mxu1 }
 0x19c   : > { %v710_v62 = vadd.f32 %v1679_v41, %v709_v61  ;;  %v2553_v41 = vld [vmem:[#allocation15 + $0xd0] sm:$0xff] }
 0x19e   : > { %v715_v63 = vmax.f32 %v710_v62, 0.0 }
 0x1a0   : > { %815 = vmatmul.f32.gmra.mxu2 %v715_v63  ;;  %844 = vmatmul.f32.gmra.mxu3 %v715_v63 }
 0x1a8   : > { %870 = vmatmul.f32.vlgmr.msrb.gmra.mxu2 %v714_v60  ;;  %899 = vmatmul.f32.vlgmr.msrb.gmra.mxu3 %v714_v60  ;;  %v2571_v60 = vld [vmem:[#allocation15 + $0x118] sm:$0xff] }
 0x1b0   : > { %873 = vmatmul.f32.gmra.mxu2 %v715_v63  ;;  %902 = vmatmul.f32.gmra.mxu3 %v715_v63  ;;  %v2573_v63 = vld [vmem:[#allocation15 + $0x120] sm:$0xff] }
 0x206   : > { %v865_v3 = vpop.f32.mrf.mxu0  ;;  %v894_v4 = vpop.f32.mrf.mxu1 }
 0x207   : > { %v866_v5 = vadd.f32 %v865_v3, %v2483_v1  ;;  %v895_v6 = vadd.f32 %v894_v4, %v2485_v2  ;;  %v2577_v3 = vld [vmem:[#allocation15 + $0x130] sm:$0xff] }
 0x208   : > { %2846 = vst [vmem:[#allocation42_spill] sm:$0xff] %v2577_v3 }
 0x209   : > { %908 = vst [vmem:[#allocation2 + $0x10] sm:$0xff] %v866_v5 }
 0x20a   : > { %909 = vst [vmem:[#allocation2 + $0x18] sm:$0xff] %v895_v6  ;;  %v2581_v6 = vld [vmem:[#allocation15 + $0x138] sm:$0xff] }
 0x20b   : > { %v807_v9 = vpop.f32.mrf.mxu2  ;;  %v836_v10 = vpop.f32.mrf.mxu3  ;;  %2847 = vst [vmem:[#allocation43_spill] sm:$0xff] %v2581_v6 }
 0x20c   : > { %v808_v11 = vadd.f32 %v807_v9, %v2489_v7  ;;  %v837_v12 = vadd.f32 %v836_v10, %v2491_v8  ;;  %v2583_v9 = vld [vmem:[#allocation15 + $0x140] sm:$0xff]  ;;  %v2585_v10 = vld [vmem:[#allocation15 + $0x148] sm:$0xff] }
 0x20d   : > { %2848 = vst [vmem:[#allocation44_spill] sm:$0xff] %v2583_v9 }
 0x20e   : > { %906 = vst [vmem:[#allocation2] sm:$0xff] %v808_v11  ;;  %v868_v13 = vpop.f32.mrf.mxu0  ;;  %v897_v14 = vpop.f32.mrf.mxu1  ;;  %v2587_v11 = vld [vmem:[#allocation15 + $0x150] sm:$0xff] }
 0x20f   : > { %907 = vst [vmem:[#allocation2 + $0x8] sm:$0xff] %v837_v12  ;;  %v869_v15 = vadd.f32 %v868_v13, %v2483_v1  ;;  %v898_v16 = vadd.f32 %v897_v14, %v2485_v2  ;;  %v2589_v12 = vld [vmem:[#allocation15 + $0x158] sm:$0xff]  ;;  %v2591_v13 = vld [vmem:[#allocation15 + $0x160] sm:$0xff]  ;;  %v2593_v14 = vld [vmem:[#allocation15 + $0x168] sm:$0xff] }
 0x210   : > { %2849 = vst [vmem:[#allocation45_spill] sm:$0xff] %v2585_v10 }
 0x211   : > { %912 = vst [vmem:[#allocation2 + $0x30] sm:$0xff] %v869_v15  ;;  %v2595_v15 = vld [vmem:[#allocation15 + $0x170] sm:$0xff] }
 0x212   : > { %913 = vst [vmem:[#allocation2 + $0x38] sm:$0xff] %v898_v16  ;;  %v2601_v16 = vld [vmem:[#allocation15 + $0x188] sm:$0xff] }
 0x213   : > { %v810_v17 = vpop.f32.mrf.mxu2  ;;  %v839_v18 = vpop.f32.mrf.mxu3 }
 0x214   : > { %v811_v19 = vadd.f32 %v810_v17, %v2489_v7  ;;  %v840_v20 = vadd.f32 %v839_v18, %v2491_v8  ;;  %v2603_v17 = vld [vmem:[#allocation15 + $0x190] sm:$0xff]  ;;  %v2605_v18 = vld [vmem:[#allocation15 + $0x198] sm:$0xff] }
 0x216   : > { %910 = vst [vmem:[#allocation2 + $0x20] sm:$0xff] %v811_v19  ;;  %v2607_v19 = vld [vmem:[#allocation15 + $0x1a0] sm:$0xff] }
 0x217   : > { %911 = vst [vmem:[#allocation2 + $0x28] sm:$0xff] %v840_v20  ;;  %v2609_v20 = vld [vmem:[#allocation15 + $0x1a8] sm:$0xff] }
 0x21b   : > { %v813_v33 = vpop.f32.mrf.mxu2  ;;  %v842_v34 = vpop.f32.mrf.mxu3 }
 0x21c   : > { %v814_v39 = vadd.f32 %v813_v33, %v2489_v7  ;;  %v843_v40 = vadd.f32 %v842_v34, %v2491_v8  ;;  %v2611_v33 = vld [vmem:[#allocation15 + $0x1b0] sm:$0xff]  ;;  %v2613_v34 = vld [vmem:[#allocation15 + $0x1b8] sm:$0xff] }
 0x21e   : > { %914 = vst [vmem:[#allocation2 + $0x40] sm:$0xff] %v814_v39  ;;  %v2615_v39 = vld [vmem:[#allocation15 + $0x1c0] sm:$0xff] }
 0x21f   : > { %915 = vst [vmem:[#allocation2 + $0x48] sm:$0xff] %v843_v40  ;;  %v2617_v40 = vld [vmem:[#allocation15 + $0x1c8] sm:$0xff] }
 0x223   : > { %v816_v61 = vpop.f32.mrf.mxu2  ;;  %v845_v62 = vpop.f32.mrf.mxu3 }
 0x224   : > { %v817_v4 = vadd.f32 %v816_v61, %v2489_v7  ;;  %v846_v5 = vadd.f32 %v845_v62, %v2491_v8  ;;  %v2597_v7 = vld [vmem:[#allocation15 + $0x178] sm:$0xff]  ;;  %v2599_v8 = vld [vmem:[#allocation15 + $0x180] sm:$0xff]  ;;  %v2619_v61 = vld [vmem:[#allocation15 + $0x1d0] sm:$0xff] }
 0x225   : > { %2850 = vst [vmem:[#allocation46_spill] sm:$0xff] %v2597_v7  ;;  %v2621_v62 = vld [vmem:[#allocation15 + $0x1d8] sm:$0xff] }
 0x226   : > { %918 = vst [vmem:[#allocation2 + $0x60] sm:$0xff] %v817_v4 }
 0x227   : > { %919 = vst [vmem:[#allocation2 + $0x68] sm:$0xff] %v846_v5 }
 0x228   : > { %2851 = vst [vmem:[#allocation47_spill] sm:$0xff] %v2599_v8 }
 0x22b   : > { %v871_v4 = vpop.f32.mrf.mxu2  ;;  %v900_v5 = vpop.f32.mrf.mxu3 }
 0x22c   : > { %v872_v21 = vadd.f32 %v871_v4, %v2483_v1  ;;  %v901_v27 = vadd.f32 %v900_v5, %v2485_v2 }
 0x22e   : > { %916 = vst [vmem:[#allocation2 + $0x50] sm:$0xff] %v872_v21 }
 0x22f   : > { %917 = vst [vmem:[#allocation2 + $0x58] sm:$0xff] %v901_v27 }
 0x233   : > { %v874_v31 = vpop.f32.mrf.mxu2  ;;  %v903_v32 = vpop.f32.mrf.mxu3 }
 0x234   : > { %v875_v30 = vadd.f32 %v874_v31, %v2483_v1  ;;  %v904_v29 = vadd.f32 %v903_v32, %v2485_v2 }
 0x236   : > { %920 = vst [vmem:[#allocation2 + $0x70] sm:$0xff] %v875_v30 }
 0x237   : > { %921 = vst [vmem:[#allocation2 + $0x78] sm:$0xff] %v904_v29 }
 0x238 LB: >> { %1003 = vmatpush.msra.mxu0 %v2623_v23  ;;  %1023 = vmatpush.msra.mxu1 %v2625_v24  ;;  %v2852_v8 = vld [vmem:[#allocation47_spill] sm:$0xff]  ;;  %v2853_v7 = vld [vmem:[#allocation46_spill] sm:$0xff]  ;;  %v2854_v9 = vld [vmem:[#allocation44_spill] sm:$0xff]  ;;  %s1435_s22 = sshll.u32 %s2105_s25, 5  ;;  %s1423_s2 = sshll.u32 %s2221_s20, 2  ;;  %s2105_s25 = sphi %s2639_s25, %s993_s25   ;;  %v2101_v26 = vphi %v986_v26, %v2872_v26   ;;  %v2097_v25 = vphi %v987_v25, %v2871_v25  }
 0x239   : >> { %1063 = vmatpush.msra.mxu3 %v2631_v28  ;;  %1043 = vmatpush.msra.mxu2 %v2627_v22  ;;  %v2855_v10 = vld [vmem:[#allocation45_spill] sm:$0xff]  ;;  %v2857_v6 = vld [vmem:[#allocation43_spill] sm:$0xff]  ;;  %v2858_v3 = vld [vmem:[#allocation42_spill] sm:$0xff]  ;;  %s998_s3 = scalar_lea.vmem [#allocation2], %s1435_s22  ;;  %s1106_s24 = sadd.s32 %s2105_s25, %s1423_s2 }
 0x23a   : >> { %1004 = vmatpush.msra.mxu0 %v2615_v39  ;;  %1024 = vmatpush.msra.mxu1 %v2617_v40  ;;  %v2856_v0 = vld [vmem:[#allocation41_spill] sm:$0xff]  ;;  %v2860_v2 = vld [vmem:[#allocation38_spill] sm:$0xff]  ;;  %v2861_v21 = vld [vmem:[#allocation40_spill] sm:$0xff]  ;;  %p1107_p1 = scmp.lt.s32.totalorder %s1106_s24, 11  ;;  %s1424_s9 = sshll.u32 %s2105_s25, 3 }
 0x23b   : >> { %1064 = vmatpush.msra.mxu3 %v2621_v62  ;;  %1044 = vmatpush.msra.mxu2 %v2619_v61  ;;  %v2859_v1 = vld [vmem:[#allocation37_spill] sm:$0xff]  ;;  %v2862_v27 = vld [vmem:[#allocation39_spill] sm:$0xff]  ;;  %v2864_v30 = vld [vmem:[#allocation34_spill] sm:$0xff]  ;;  %s1114_s10 = scalar_lea.vmem [#allocation3], %s1424_s9  ;;  %s993_s25 = sadd.s32 1, %s2105_s25  }
 0x23c   : >> { %1005 = vmatpush.msra.mxu0 %v2607_v19  ;;  %1025 = vmatpush.msra.mxu1 %v2609_v20  ;;  %v2863_v29 = vld [vmem:[#allocation33_spill] sm:$0xff]  ;;  %v2865_v31 = vld [vmem:[#allocation36_spill] sm:$0xff]  ;;  %v2866_v32 = vld [vmem:[#allocation35_spill] sm:$0xff]  ;;  %s1108_s11 = scalar_select %p1107_p1, 1, 0 }
 0x23d   : >> { %1065 = vmatpush.msra.mxu3 %v2613_v34  ;;  %1045 = vmatpush.msra.mxu2 %v2611_v33  ;;  %v2867_v4 = vld [vmem:[#allocation29_spill] sm:$0xff]  ;;  %v2868_v5 = vld [vmem:[#allocation30_spill] sm:$0xff]  ;;  %p990_p4 = scmp.ge.s32.totalorder %s993_s25, 4  }
 0x23e   : >> { %1006 = vmatpush.msra.mxu0 %v2852_v8  ;;  %1026 = vmatpush.msra.mxu1 %v2601_v16  ;;  %v1132_v22 = vld [vmem:[#allocation16 + $0x50] sm:$0xff] (%p990_p4)  ;;  %v1131_v23 = vld [vmem:[#allocation16 + $0x48] sm:$0xff] (%p990_p4)  ;;  %v1130_v24 = vld [vmem:[#allocation16 + $0x40] sm:$0xff] (%p990_p4)  ;;  %s2118_s19 = smov (%p990_p4), [#allocation19]   ;;  %s1209_s18 = sshll.u32 (%p990_p4), %s2799_s13, 4  ;;  %s1210_s18 = int_to_ptr.hbm [resolvable:$true] %s1209_s18 }
 0x23f   : >> { %1066 = vmatpush.msra.mxu3 %v2605_v18  ;;  %1046 = vmatpush.msra.mxu2 %v2603_v17  ;;  %v1128_v28 = vld [vmem:[#allocation16 + $0x30] sm:$0xff] (%p990_p4)  ;;  %s1207_s7 = sshll.u32 (%p990_p4), %s2118_s19, 4  ;;  %p2873_p11 = scmp.eq.s32.totalorder (%p990_p4), %s2221_s20, 2  ;;  %s1208_s7 = int_to_ptr.vmem [resolvable:$true] %s1207_s7 }
 0x240   : >> { %1007 = vmatpush.msra.mxu0 %v2591_v13  ;;  %1027 = vmatpush.msra.mxu1 %v2593_v14  ;;  %s2874_s25 = sld [smem:[#allocation57_spill]] (%p990_p4)  ;;  %s1180_s17 = scalar_lea.sflag (%p990_p4), [#allocation6], %s2338_s28 }
 0x241   : >> { %1067 = vmatpush.msra.mxu3 %v2853_v7  ;;  %1047 = vmatpush.msra.mxu2 %v2595_v15  ;;  %p2875_p12 = pmov (%p990_p4), %p2873_p11  ;;  %s2876_s9 = sld [smem:[#allocation55_spill]] (%p990_p4) }
 0x242   : >> { %1008 = vmatpush.msra.mxu0 %v2854_v9  ;;  %1028 = vmatpush.msra.mxu1 %v2855_v10  ;;  %s2877_s21 = sld [smem:[#allocation56_spill]] (%p990_p4) }
 0x243   : >> { %1068 = vmatpush.msra.mxu3 %v2589_v12  ;;  %1048 = vmatpush.msra.mxu2 %v2587_v11 }
 0x244   : >> { %1009 = vmatpush.msra.mxu0 %v2573_v63  ;;  %1029 = vmatpush.msra.mxu1 %v2856_v0 }
 0x245   : >> { %1069 = vmatpush.msra.mxu3 %v2857_v6  ;;  %1049 = vmatpush.msra.mxu2 %v2858_v3 }
 0x246   : >> { %1010 = vmatpush.msra.mxu0 %v2565_v55  ;;  %1030 = vmatpush.msra.mxu1 %v2567_v57  ;;  %s1221_s22 = sshll.u32 (%p990_p4), %s2874_s25, 4  ;;  %s1222_s22 = int_to_ptr.hbm [resolvable:$true] %s1221_s22 }
 0x247   : >> { %1070 = vmatpush.msra.mxu3 %v2571_v60  ;;  %1050 = vmatpush.msra.mxu2 %v2569_v59 }
 0x248   : >> { %1011 = vmatpush.msra.mxu0 %v2557_v45  ;;  %1031 = vmatpush.msra.mxu1 %v2559_v46  ;;  %s2015_s24 = scalar_lea.hbm (%p990_p4), %s2877_s21, 96 }
 0x249   : >> { %1071 = vmatpush.msra.mxu3 %v2563_v51  ;;  %1051 = vmatpush.msra.mxu2 %v2561_v50 }
 0x24a   : >> { %1012 = vmatpush.msra.mxu0 %v2549_v56  ;;  %1032 = vmatpush.msra.mxu1 %v2551_v58 }
 0x24b   : >> { %1072 = vmatpush.msra.mxu3 %v2555_v42  ;;  %1052 = vmatpush.msra.mxu2 %v2553_v41 }
 0x24c   : >> { %1013 = vmatpush.msra.mxu0 %v2541_v52  ;;  %1033 = vmatpush.msra.mxu1 %v2543_v53 }
 0x24d   : >> { %1073 = vmatpush.msra.mxu3 %v2547_v54  ;;  %1053 = vmatpush.msra.mxu2 %v2545_v38  ;;  %v1690_v38 = vld [vmem:[%s2876_s9] ss:$0 sm:$0xff] (%p990_p4) }
 0x24e   : >> { %1014 = vmatpush.msra.mxu0 %v2533_v44  ;;  %1034 = vmatpush.msra.mxu1 %v2535_v47  ;;  %v1123_v44 = vld [vmem:[#allocation16 + $0x8] sm:$0xff] (%p990_p4)  ;;  %v1122_v47 = vld [vmem:[#allocation16] sm:$0xff] (%p990_p4) }
 0x24f   : >> { %1074 = vmatpush.msra.mxu3 %v2539_v49  ;;  %1054 = vmatpush.msra.mxu2 %v2537_v48 }
 0x250   : >> { %1015 = vmatpush.msra.mxu0 %v2523_v35  ;;  %1035 = vmatpush.msra.mxu1 %v2525_v36  ;;  %v1127_v35 = vld [vmem:[#allocation16 + $0x28] sm:$0xff] (%p990_p4)  ;;  %v1126_v36 = vld [vmem:[#allocation16 + $0x20] sm:$0xff] (%p990_p4) }
 0x251   : >> { %1075 = vmatpush.msra.mxu3 %v2531_v43  ;;  %1055 = vmatpush.msra.mxu2 %v2527_v37  ;;  %v1125_v37 = vld [vmem:[#allocation16 + $0x18] sm:$0xff] (%p990_p4)  ;;  %v1124_v43 = vld [vmem:[#allocation16 + $0x10] sm:$0xff] (%p990_p4) }
 0x252   : >> { %1016 = vmatpush.msra.mxu0 %v2859_v1  ;;  %1036 = vmatpush.msra.mxu1 %v2860_v2  ;;  %v2869_v1 = vld [vmem:[#allocation32_spill] sm:$0xff]  ;;  %v2870_v2 = vld [vmem:[#allocation31_spill] sm:$0xff] }
 0x253   : >> { %1076 = vmatpush.msra.mxu3 %v2861_v21  ;;  %1056 = vmatpush.msra.mxu2 %v2862_v27  ;;  %v999_v21 = vld [vmem:[%s998_s3] sm:$0xff]  ;;  %v1000_v27 = vld [vmem:[%s998_s3 + $0x8] sm:$0xff] }
 0x254   : >> { %1017 = vmatpush.msra.mxu0 %v2863_v29  ;;  %1037 = vmatpush.msra.mxu1 %v2864_v30 }
 0x255   : >> { %1077 = vmatpush.msra.mxu3 %v2865_v31  ;;  %1057 = vmatpush.msra.mxu2 %v2866_v32 }
 0x256   : >> { %1018 = vmatpush.msra.mxu0 %v2867_v4  ;;  %1038 = vmatpush.msra.mxu1 %v2868_v5 }
 0x257   : >> { %1078 = vmatpush.msra.mxu3 %v2869_v1  ;;  %1019 = vmatmul.f32.vlgmr.msra.gmra.mxu0 %v2101_v26  ;;  %v1002_v1 = vld [vmem:[%s998_s3 + $0x18] sm:$0xff] }
 0x258   : >> { %1039 = vmatmul.f32.vlgmr.msra.gmra.mxu1 %v2101_v26  ;;  %1079 = vmatmul.f32.vlgmr.msra.gmra.mxu3 %v2101_v26 }
 0x259   : >> { %1058 = vmatpush.msra.mxu2 %v2870_v2  ;;  %v1001_v2 = vld [vmem:[%s998_s3 + $0x10] sm:$0xff]  ;;  %s2119_s3 = smov (%p990_p4), [#allocation21]  }
 0x25a   : >> { %1059 = vmatmul.f32.vlgmr.msra.gmra.mxu2 %v2101_v26  ;;  %s1219_s2 = sshll.u32 (%p990_p4), %s2119_s3, 4  ;;  %s1220_s2 = int_to_ptr.vmem [resolvable:$true] %s1219_s2 }
 0x2d4   : >> { %v1020_v29 = vpop.f32.mrf.mxu0 }
 0x2d5   : >> { %v1083_v30 = vadd.f32 %v1020_v29, %v999_v21  ;;  %v1040_v31 = vpop.f32.mrf.mxu1 }
 0x2d6   : >> { %v1084_v32 = vadd.f32 %v1040_v31, %v1000_v27  ;;  %v1109_v31 = vstv %s1108_s11 }
 0x2d7   : >> { %v1087_v4 = vmul.f32 0.5, %v1083_v30  ;;  %vm1110_vm0 = vcmp.eq.s32.totalorder %v1109_v31, 1 }
 0x2d8   : >> { %v1088_v5 = vmul.f32 0.5, %v1084_v32 }
 0x2d9   : >> { %1680 = vtanh.f32 %v1087_v4 }
 0x2da   : >> { %1682 = vtanh.f32 %v1088_v5 }
 0x2db   : >> { %v1080_v0 = vpop.f32.mrf.mxu3 }
 0x2dc   : >> { %v1086_v3 = vadd.f32 %v1080_v0, %v1002_v1 }
 0x2dd   : >> { %v1060_v6 = vpop.f32.mrf.mxu2 }
 0x2de   : >> { %1684 = vtanh.f32 %v1086_v3  ;;  %v1085_v7 = vadd.f32 %v1060_v6, %v1001_v2 }
 0x2df   : >> { %v1681_v8 = vpop.eup %1680 }
 0x2e0   : >> { %v1683_v9 = vpop.eup %1682  ;;  %v1093_v21 = vmul.f32 0.5, %v1681_v8  ;;  %v1089_v29 = vmul.f32 0.5, %v1085_v7 }
 0x2e1   : >> { %v1094_v27 = vmul.f32 0.5, %v1683_v9 }
 0x2e2   : >> { %v1096_v30 = vadd.f32 0.5, %v1093_v21  ;;  %1686 = vtanh.f32 %v1089_v29  ;;  %v1136_v21 = vld [vmem:[#allocation16 + $0x70] sm:$0xff] (%p990_p4)  ;;  %v1135_v29 = vld [vmem:[#allocation16 + $0x68] sm:$0xff] (%p990_p4) }
 0x2e3   : >> { %v1097_v32 = vadd.f32 0.5, %v1094_v27  ;;  %v1133_v27 = vld [vmem:[#allocation16 + $0x58] sm:$0xff] (%p990_p4) }
 0x2e4   : >> { %v1685_v4 = vpop.eup %1684 }
 0x2e5   : >> { %v1100_v5 = vmul.f32 %v2097_v25, %v1097_v32  ;;  %v1101_v10 = vmul.f32 %v1685_v4, %v1096_v30 }
 0x2e7   : >> { %v1102_v0 = vadd.f32 %v1101_v10, %v1100_v5  ;;  %v1137_v10 = vld [vmem:[#allocation16 + $0x78] sm:$0xff] (%p990_p4) }
 0x2e8   : >> { %v1687_v1 = vpop.eup %1686  ;;  %1470 = vmatpush.msra.mxu2 (%p990_p4), %v1137_v10  ;;  %1471 = vmatpush.msra.mxu3 (%p990_p4), %v1137_v10 }
 0x2e9   : >> { %1688 = vtanh.f32 %v1102_v0  ;;  %v1112_v3 = vsel %vm1110_vm0, %v1102_v0, %v2097_v25   ;;  %v1095_v6 = vmul.f32 0.5, %v1687_v1  ;;  %1142 = vmatpush.msra.mxu0 (%p990_p4), %v1137_v10  ;;  %1469 = vmatpush.msra.mxu1 (%p990_p4), %v1137_v10 }
 0x2ea   : >> { %v2871_v25 = vmov %v1112_v3  ;;  %1117 = vst [vmem:[#allocation21] sm:$0xff] (%p990_p4), %v1112_v3  ;;  %1473 = vmatpush.msra.mxu2 (%p990_p4), %v1136_v21  ;;  %1474 = vmatpush.msra.mxu3 (%p990_p4), %v1136_v21 }
 0x2eb   : >> { %v1098_v2 = vadd.f32 0.5, %v1095_v6  ;;  %1143 = vmatpush.msra.mxu0 (%p990_p4), %v1136_v21  ;;  %1472 = vmatpush.msra.mxu1 (%p990_p4), %v1136_v21  ;;  %v1129_v25 = vld [vmem:[#allocation16 + $0x38] sm:$0xff] (%p990_p4) }
 0x2ec   : > { %1476 = vmatpush.msra.mxu2 (%p990_p4), %v1135_v29  ;;  %1477 = vmatpush.msra.mxu3 (%p990_p4), %v1135_v29 }
 0x2ed   : > { %1144 = vmatpush.msra.mxu0 (%p990_p4), %v1135_v29  ;;  %1475 = vmatpush.msra.mxu1 (%p990_p4), %v1135_v29 }
 0x2ef   : >> { %v1689_v7 = vpop.eup %1688  ;;  %992 = sbr.rel (!%p990_p4) target bundleno = 568 (0x238), region = 170 }
 0x2f0   : >> { %v1104_v8 = vmul.f32 %v1689_v7, %v1098_v2 }
 0x2f2   : >> { %v1111_v9 = vsel %vm1110_vm0, %v1104_v8, %v2101_v26  }
 0x2f3   : >> { %1115 = vst [vmem:[%s1114_s10] sm:$0xff] %v1111_v9  ;;  %v2872_v26 = vmov %v1111_v9  ;;  %s1436_s10 = sshll.u32 (%p990_p4), %s2221_s20, 5 }
 0x2f4   : > { %1116 = vst [vmem:[#allocation19] sm:$0xff] %v1111_v9  ;;  %v1134_v26 = vld [vmem:[#allocation16 + $0x60] sm:$0xff]  ;;  %s1191_s12 = scalar_lea.hbm %s2877_s21, %s1436_s10 }
 0x2f5   : > { %1479 = vmatpush.msra.mxu2 %v1134_v26  ;;  %1480 = vmatpush.msra.mxu3 %v1134_v26  ;;  %1549 = dma.vmem_to_hbm [thread:$0]  (%p2873_p11), %s1208_s7, 128, %s1210_s18, [#allocation20]  }
 0x2f6   : > { %1145 = vmatpush.msra.mxu0 %v1134_v26  ;;  %1478 = vmatpush.msra.mxu1 %v1134_v26  ;;  %1551 = dma.vmem_to_hbm [thread:$0]  (%p2875_p12), %s1220_s2, 128, %s1222_s22, [#allocation20]  }
 0x2f7   : > { %1482 = vmatpush.msra.mxu2 %v1133_v27  ;;  %1483 = vmatpush.msra.mxu3 %v1133_v27  ;;  %s1192_s18 = sshll.u32 %s2364_s5, 4  ;;  %s1194_s27 = sshll.u32 %s1191_s12, 4  ;;  %s1193_s18 = int_to_ptr.vmem [resolvable:$true] %s1192_s18  ;;  %s1195_s27 = int_to_ptr.hbm [resolvable:$true] %s1194_s27 }
 0x2f8   : > { %1146 = vmatpush.msra.mxu0 %v1133_v27  ;;  %1481 = vmatpush.msra.mxu1 %v1133_v27  ;;  %s2009_s25 = sshra.s32 %s1195_s27, 4  ;;  %s2010_s25 = int_to_ptr.hbm [resolvable:$true] %s2009_s25 }
 0x2f9   : > { %1485 = vmatpush.msra.mxu2 %v1132_v22  ;;  %1486 = vmatpush.msra.mxu3 %v1132_v22  ;;  %s2011_s22 = scalar_lea.hbm %s2010_s25, 32  ;;  %p2016_p10 = scmp.lt.s32.totalorder %s2010_s25, %s2877_s21 }
 0x2fa   : > { %1147 = vmatpush.msra.mxu0 %v1132_v22  ;;  %1484 = vmatpush.msra.mxu1 %v1132_v22  ;;  %v1120_v48 = vld [vmem:[#allocation3 + $0x10] sm:$0xff]  ;;  %v1121_v49 = vld [vmem:[#allocation3 + $0x18] sm:$0xff]  ;;  %v1118_v52 = vld [vmem:[#allocation3] sm:$0xff]  ;;  %p2012_p8 = scmp.ne.s32.totalorder %s2010_s25, %s2011_s22  ;;  %p2017_p0 = scmp.lt.s32.totalorder %s2015_s24, %s2011_s22 }
 0x2fb   : > { %1488 = vmatpush.msra.mxu2 %v1131_v23  ;;  %1489 = vmatpush.msra.mxu3 %v1131_v23  ;;  %v1119_v53 = vld [vmem:[#allocation3 + $0x8] sm:$0xff] }
 0x2fc   : > { %1148 = vmatpush.msra.mxu0 %v1131_v23  ;;  %1487 = vmatpush.msra.mxu1 %v1131_v23  ;;  %p2013_p7 = pnand %p2012_p8, %p2304_p13  ;;  %p2018_p2 = por %p2017_p0, %p2016_p10 }
 0x2fd   : > { %1491 = vmatpush.msra.mxu2 %v1130_v24  ;;  %1492 = vmatpush.msra.mxu3 %v1130_v24 }
 0x2fe   : > { %1149 = vmatpush.msra.mxu0 %v1130_v24  ;;  %1490 = vmatpush.msra.mxu1 %v1130_v24  ;;  %p2014_p9 = pneg %p2013_p7 }
 0x2ff   : > { %1494 = vmatpush.msra.mxu2 %v1129_v25  ;;  %1495 = vmatpush.msra.mxu3 %v1129_v25 }
 0x300   : > { %1150 = vmatpush.msra.mxu0 %v1129_v25  ;;  %1493 = vmatpush.msra.mxu1 %v1129_v25  ;;  %p2019_p6 = pnand %p2018_p2, %p2014_p9 }
 0x301   : > { %1497 = vmatpush.msra.mxu2 %v1128_v28  ;;  %1498 = vmatpush.msra.mxu3 %v1128_v28 }
 0x302   : > { %1151 = vmatpush.msra.mxu0 %v1128_v28  ;;  %1496 = vmatpush.msra.mxu1 %v1128_v28 }
 0x303   : > { %1500 = vmatpush.msra.mxu2 %v1127_v35  ;;  %1501 = vmatpush.msra.mxu3 %v1127_v35 }
 0x304   : > { %1152 = vmatpush.msra.mxu0 %v1127_v35  ;;  %1499 = vmatpush.msra.mxu1 %v1127_v35 }
 0x305   : > { %1503 = vmatpush.msra.mxu2 %v1126_v36  ;;  %1504 = vmatpush.msra.mxu3 %v1126_v36 }
 0x306   : > { %1153 = vmatpush.msra.mxu0 %v1126_v36  ;;  %1502 = vmatpush.msra.mxu1 %v1126_v36 }
 0x307   : > { %1506 = vmatpush.msra.mxu2 %v1125_v37  ;;  %1507 = vmatpush.msra.mxu3 %v1125_v37 }
 0x308   : > { %1154 = vmatpush.msra.mxu0 %v1125_v37  ;;  %1505 = vmatpush.msra.mxu1 %v1125_v37 }
 0x309   : > { %1509 = vmatpush.msra.mxu2 %v1124_v43  ;;  %1510 = vmatpush.msra.mxu3 %v1124_v43 }
 0x30a   : > { %1155 = vmatpush.msra.mxu0 %v1124_v43  ;;  %1508 = vmatpush.msra.mxu1 %v1124_v43 }
 0x30b   : > { %1512 = vmatpush.msra.mxu2 %v1123_v44  ;;  %1513 = vmatpush.msra.mxu3 %v1123_v44 }
 0x30c   : > { %1156 = vmatpush.msra.mxu0 %v1123_v44  ;;  %1511 = vmatpush.msra.mxu1 %v1123_v44 }
 0x30d   : > { %1515 = vmatpush.msra.mxu2 %v1122_v47  ;;  %1516 = vmatpush.msra.mxu3 %v1122_v47 }
 0x30e   : > { %1164 = vmatmul.f32.vlgmr.msra.gmra.mxu2 %v1120_v48  ;;  %1167 = vmatmul.f32.vlgmr.msra.gmra.mxu3 %v1121_v49 }
 0x30f   : > { %1157 = vmatpush.msra.mxu0 %v1122_v47  ;;  %1514 = vmatpush.msra.mxu1 %v1122_v47 }
 0x310   : > { %1158 = vmatmul.f32.vlgmr.msra.gmra.mxu0 %v1118_v52  ;;  %1161 = vmatmul.f32.vlgmr.msra.gmra.mxu1 %v1119_v53 }
 0x38d   : > { %v1159_v54 = vpop.f32.mrf.mxu0  ;;  %v1162_v56 = vpop.f32.mrf.mxu1 }
 0x38e   : > { %v1160_v58 = vadd.f32 %v1690_v38, %v1159_v54  ;;  %v1163_v41 = vadd.f32 %v1690_v38, %v1162_v56 }
 0x390   : > { %1691 = vtanh.f32 %v1160_v58 }
 0x391   : > { %1693 = vtanh.f32 %v1163_v41  ;;  %v1165_v42 = vpop.f32.mrf.mxu2  ;;  %v1168_v45 = vpop.f32.mrf.mxu3 }
 0x392   : > { %v1166_v46 = vadd.f32 %v1690_v38, %v1165_v42  ;;  %v1169_v50 = vadd.f32 %v1690_v38, %v1168_v45 }
 0x394   : > { %1695 = vtanh.f32 %v1166_v46 }
 0x395   : > { %1697 = vtanh.f32 %v1169_v50 }
 0x396   : > { %v1692_v51 = vpop.eup %1691 }
 0x397   : > { %v1694_v55 = vpop.eup %1693  ;;  %1175 = vst [vmem:[%s2364_s5] sm:$0xff] %v1692_v51 }
 0x398   : > { %1176 = vst [vmem:[%s2364_s5 + $0x8] sm:$0xff] %v1694_v55 }
 0x39a   : > { %v1696_v57 = vpop.eup %1695 }
 0x39b   : > { %v1698_v59 = vpop.eup %1697  ;;  %1177 = vst [vmem:[%s2364_s5 + $0x10] sm:$0xff] %v1696_v57 }
 0x39c   : > { %1178 = vst [vmem:[%s2364_s5 + $0x18] sm:$0xff] %v1698_v59 }
 0x39d   : > { %2022 = shalt.err (!%p2019_p6)
}
 0x39e   : > { %s2120_s28 = smov 128   ;;  %s2121_s5 = smov 8  }
 0x39f   : > { %1547 = dma.vmem_to_hbm [thread:$0]  (%p2304_p13), %s1193_s18, 512, %s1195_s27, %s1180_s17, %s2120_s28, %s2120_s28, %s2121_s5  }
 0x3a0   : > { %p2878_p3 = pmov %p2873_p11 }
 0x3a2   : > { %2072 = dma.done.wait (%p2878_p3), [#allocation20], 256   ;;  %p2879_p1 = pmov %p2878_p3 }
 0x3a4   : > { %2074 = vsyncadd (%p2879_p1), [#allocation20], 4294967040 }
 0x3a5 PF: > { %p1606_p4 = scmp.ge.s32.totalorder %s2093_s16, 2  ;;  %s1243_s10 = sand.u32 1, %s2081_s29  }
 0x3a6   : > { %s1244_s19 = scalar_lea.sflag [#allocation6], %s1243_s10 }
 0x3a7   : > { %p1584_p11 = pnand %p1606_p4, %p2309_p5 }
 0x3a9   : > { %p1585_p12 = pneg %p1584_p11 }
 0x3ab   : > { %2076 = dma.done.wait (%p1585_p12), %s1244_s19, 512  }
 0x3ac   : > { %2078 = vsyncadd (%p1585_p12), %s1244_s19, 4294966784  ;;  %p33_p13 = scmp.ge.s32.totalorder %s2282_s1, 5   ;;  %s2880_s29 = smov %s2085_s30 }
 0x3ad   : > { %s2881_s30 = smov %s2089_s15  ;;  %s2882_s15 = smov %s2294_s14 }
 0x3ae   : > { %s2883_s16 = smov %s2282_s1  ;;  %35 = sbr.rel (!%p33_p13) target bundleno = 21 (0x15), region = 181 }
 0x3b3   :  { %1250 = vsyncpa [#allocation5], 1 }
 0x3b4   :  { %1252 = vsyncpa [#allocation5 + $0x1], 1 }
 0x3b5   :  { %1253 = vsyncpa [#allocation8], 1 }
 0x3b6   :  { %1254 = vsyncpa [#allocation11], 1 }
 0x3b7   :  { %1255 = vsyncpa [#allocation14], 1 }
 0x3b8   :  { %1256 = vsyncpa [#allocation17], 1 }
 0x3b9   :  { %1257 = vsyncpa [#allocation6], 1 }
 0x3ba   :  { %1259 = vsyncpa [#allocation6 + $0x1], 1 }
 0x3bb   :  { %1260 = vsyncpa [#allocation20], 1 }

</bundles_post_ra>
